<compile_context>
chip_gen: v7x
topology: tpu7x:2x2x1
jax: 0.10.0
libtpu: 0.0.40
codegen_flags: <defaults>
</compile_context>

<pallas_src>
import jax
import jax.numpy as jnp
from jax.experimental import pallas as pl
from jax.experimental.pallas import tpu as pltpu


def _round_up(x, m):
    return (x + m - 1) // m * m


def _vmem_capacity_bytes():
    """Per-core VMEM capacity; conservative fallback if the query fails."""
    try:
        return int(pltpu.get_tpu_info().vmem_capacity_bytes)
    except Exception:  # any failure -> assume the smallest (v7x: 64 MiB/core)
        return 64 << 20


def _pick_t_block(T, max_blk):
    """Time-block size.

    t_blk is the second-to-last dim of the batch-major output block, so it
    must be a multiple of 8 or equal to the full sequence length T.
    """
    if T <= max_blk:
        return T
    best = 0
    for cand in range(8, max_blk + 1, 8):
        if T % cand == 0:
            best = cand
    if best:
        return best
    for cand in range(8, T, 8):   # smallest aligned divisor (keeps layout legal)
        if T % cand == 0:
            return cand
    return T                      # no aligned divisor at all: whole sequence


def _gru_kernel(gates_ref, h0_ref, wh_hbm_ref, bhn_ref, out_ref,
                h_scratch, wh_vmem, wh_sem):
    """One grid step = one (batch block, time block) tile.

    gates_ref : (T_BLK, B_BLK, 3*Hp) bf16 -- precomputed x@W_i + folded biases
    h0_ref    : (B_BLK, Hp)          f32  -- initial hidden state (this batch block)
    wh_hbm_ref: (Hp, 3*Hp)           bf16 -- fused [W_hr|W_hz|W_hn], raw HBM ref
    bhn_ref   : (1, Hp)              f32  -- b_hn (must stay inside r * (.))
    out_ref   : (B_BLK, T_BLK, Hp)   f32  -- hidden states, batch-major
    h_scratch : (B_BLK, Hp)          f32  -- hidden state carried across time blocks
    wh_vmem   : (Hp, 3*Hp)           bf16 -- single-buffered VMEM copy of W_h
    wh_sem    : DMA semaphore
    """
    tb = pl.program_id(1)   # time-block index (serial / "arbitrary")

    @pl.when(tb == 0)
    def _():
        # W_h is grid-invariant: fetch it once per batch block into a
        # single-buffered VMEM scratch (the default BlockSpec pipeline would
        # hold two copies, which is wasteful / fatal for large H on v7x).
        cp = pltpu.make_async_copy(wh_hbm_ref, wh_vmem, wh_sem)
        cp.start()
        cp.wait()
        h_scratch[...] = h0_ref[...]

    b_blk, hp = h_scratch.shape
    t_blk = out_ref.shape[1]

    # Grid-step invariants, hoisted out of the unrolled time loop.
    wh = wh_vmem[...]                                        # (Hp, 3Hp) bf16
    bhn = jnp.broadcast_to(bhn_ref[...], (b_blk, hp))        # (B_BLK, Hp) f32

    h = h_scratch[...]                                       # f32 carry
    # Static (unrolled) time loop; t_blk is capped by the wrapper so code size
    # stays bounded while the grid amortizes per-step overhead.
    for j in range(t_blk):
        gi = gates_ref[j]                                    # (B_BLK, 3Hp) bf16
        # The only op on the serial critical path: native-bf16 MXU matmul,
        # accumulated in f32.
        gh = jnp.dot(h.astype(jnp.bfloat16), wh,
                     preferred_element_type=jnp.float32)     # (B_BLK, 3Hp) f32

        r = jax.nn.sigmoid(gi[:, 0:hp] + gh[:, 0:hp])
        z = jax.nn.sigmoid(gi[:, hp:2 * hp] + gh[:, hp:2 * hp])
        n = jnp.tanh(gi[:, 2 * hp:3 * hp] + r * (gh[:, 2 * hp:3 * hp] + bhn))
        h = n + z * (h - n)                                  # == (1-z)*n + z*h

        # Batch-major, lane-dense (Hp) store -> no post-kernel transpose.
        out_ref[:, j:j + 1, :] = h[:, None, :]

    h_scratch[...] = h


@jax.jit
def gru_forward(inputs, hidden_states, params):
    """inputs: (B, T, I) f32; hidden_states: (1, B, H) f32.

    Returns (outputs (B, T, H), final_hidden (1, B, H)).
    """
    B, T, I = inputs.shape
    H = hidden_states.shape[2]

    Bp = _round_up(B, 8)      # sublane-dense batch
    # Lane-dense per-gate width; align to 256 for large H so v6e/v7x's 256-wide
    # MXU passes run full (128 alignment is already optimal on v5e / small H).
    Hp = _round_up(H, 256) if H > 128 else _round_up(H, 128)

    # Batch-block "parallel" grid axis: lets v7x's 2 TensorCores each run an
    # independent batch shard of the recurrence.  Only split when both shards
    # stay sublane-aligned.  (To approach MXU roofline, pack more sequences
    # into the batch: with Bp=8 the per-step matmul uses <6% of the MXU rows.)
    n_bb = 2 if (Bp >= 16 and Bp % 16 == 0) else 1
    b_blk = Bp // n_bb

    # --- Weight / bias preparation (pre-transposed + zero-padded, gate order r|z|n) ---
    def pad_wi(w):            # (H, I) -> (I, Hp)
        return jnp.pad(w.T, ((0, 0), (0, Hp - H)))

    def pad_wh(w):            # (H, H) -> (Hp, Hp)
        return jnp.pad(w.T, ((0, Hp - H), (0, Hp - H)))

    def pad_b(b):             # (H,) -> (Hp,)
        return jnp.pad(b, (0, Hp - H))

    w_i = jnp.concatenate(
        [pad_wi(params["w_ir"]), pad_wi(params["w_iz"]), pad_wi(params["w_in"])],
        axis=1)                                                        # (I, 3Hp) f32
    # Fold b_ir+b_hr and b_iz+b_hz into the hoisted input projection; keep b_in
    # there too.  b_hn must stay separate (multiplied by r inside the kernel).
    b_i = jnp.concatenate(
        [pad_b(params["b_ir"] + params["b_hr"]),
         pad_b(params["b_iz"] + params["b_hz"]),
         pad_b(params["b_in"])], axis=0)                               # (3Hp,) f32

    w_h = jnp.concatenate(
        [pad_wh(params["w_hr"]), pad_wh(params["w_hz"]), pad_wh(params["w_hn"])],
        axis=1).astype(jnp.bfloat16)                                   # (Hp, 3Hp) bf16
    b_hn = pad_b(params["b_hn"])[None, :]                              # (1, Hp) f32

    # --- Hoisted input projection (time-major), streamed into the kernel as bf16 ---
    gates_i = jnp.einsum("bti,ih->tbh", inputs, w_i) + b_i[None, None, :]
    gates_i = jnp.pad(gates_i, ((0, 0), (0, Bp - B), (0, 0)))
    gates_i = gates_i.astype(jnp.bfloat16)                             # (T, Bp, 3Hp)

    h0 = jnp.pad(hidden_states[0], ((0, Bp - B), (0, Hp - H)))         # (Bp, Hp) f32

    # --- VMEM-budget-driven time block + explicit scoped-VMEM limit ---
    fixed_bytes = (Hp * 3 * Hp * 2          # W_h VMEM scratch (bf16, single copy)
                   + 2 * b_blk * Hp * 4     # h0 (double-buffered)
                   + 2 * Hp * 4             # b_hn (double-buffered)
                   + b_blk * Hp * 4)        # h carry scratch
    per_t_bytes = b_blk * (2 * 3 * Hp * 2   # gates block (bf16, double-buffered)
                           + 2 * Hp * 4)    # out block (f32, double-buffered)
    vmem_cap = _vmem_capacity_bytes()
    budget = int(vmem_cap * 0.6)
    if budget > fixed_bytes:
        max_blk = max(1, min(16, (budget - fixed_bytes) // per_t_bytes))
    else:
        max_blk = 1                         # TODO(synk): for huge H, W_h itself
                                            # would need K-splitting of the matmul.
    t_blk = _pick_t_block(T, max_blk)
    n_tb = T // t_blk

    working_set = fixed_bytes + per_t_bytes * t_blk
    vmem_limit = int(min(max(working_set * 1.25 + (4 << 20), 16 << 20),
                         vmem_cap * 0.9))

    out_bm = pl.pallas_call(
        _gru_kernel,
        out_shape=jax.ShapeDtypeStruct((Bp, T, Hp), jnp.float32),
        grid_spec=pltpu.PrefetchScalarGridSpec(
            num_scalar_prefetch=0,
            grid=(n_bb, n_tb),
            in_specs=[
                pl.BlockSpec((t_blk, b_blk, 3 * Hp), lambda bb, tb: (tb, bb, 0)),
                pl.BlockSpec((b_blk, Hp), lambda bb, tb: (bb, 0)),
                pl.BlockSpec(memory_space=pl.ANY),   # W_h stays in HBM; manual DMA
                pl.BlockSpec((1, Hp), lambda bb, tb: (0, 0)),
            ],
            out_specs=pl.BlockSpec((b_blk, t_blk, Hp), lambda bb, tb: (bb, tb, 0)),
            scratch_shapes=[
                pltpu.VMEM((b_blk, Hp), jnp.float32),     # hidden-state carry
                pltpu.VMEM((Hp, 3 * Hp), jnp.bfloat16),   # single-buffered W_h
                pltpu.SemaphoreType.DMA(()),
            ],
        ),
        compiler_params=pltpu.CompilerParams(
            dimension_semantics=("parallel", "arbitrary"),  # batch ||, time serial
            vmem_limit_bytes=vmem_limit),
    )(gates_i, h0, w_h, b_hn)

    # Strip padding.  Output is already batch-major -> no transpose needed.
    outputs = out_bm[:B, :, :H]                              # (B, T, H)
    final_hidden = outputs[:, -1, :][None, :, :]             # (1, B, H)
    return outputs, final_hidden


def gru_reference(inputs, hidden_states, params):
    """Pure-JAX f32 reference reproducing the PyTorch loop semantics."""
    B, T, I = inputs.shape
    h = hidden_states[0]  # (B, H)
    outs = []
    for j in range(T):
        x = inputs[:, j, :]
        r = jax.nn.sigmoid(x @ params["w_ir"].T + params["b_ir"]
                           + h @ params["w_hr"].T + params["b_hr"])
        z = jax.nn.sigmoid(x @ params["w_iz"].T + params["b_iz"]
                           + h @ params["w_hz"].T + params["b_hz"])
        n = jnp.tanh(x @ params["w_in"].T + params["b_in"]
                     + r * (h @ params["w_hn"].T + params["b_hn"]))
        h = (1.0 - z) * n + z * h
        outs.append(h)
    return jnp.stack(outs, axis=1), h[None, :, :]


def init_params(key, input_size, hidden_size):
    bound = (1.0 / hidden_size) ** 0.5
    names_shapes = [
        ("w_ir", (hidden_size, input_size)),
        ("w_iz", (hidden_size, input_size)),
        ("w_in", (hidden_size, input_size)),
        ("b_ir", (hidden_size,)),
        ("b_iz", (hidden_size,)),
        ("b_in", (hidden_size,)),
        ("w_hr", (hidden_size, hidden_size)),
        ("w_hz", (hidden_size, hidden_size)),
        ("w_hn", (hidden_size, hidden_size)),
        ("b_hr", (hidden_size,)),
        ("b_hz", (hidden_size,)),
        ("b_hn", (hidden_size,)),
    ]
    params = {}
    keys = jax.random.split(key, len(names_shapes))
    for k, (name, shape) in zip(keys, names_shapes):
        params[name] = jax.random.uniform(
            k, shape, dtype=jnp.float32, minval=-bound, maxval=bound)
    return params


if __name__ == "__main__":
    batch, seq_len, input_size, hidden_size = 2, 8, 16, 32

    key = jax.random.PRNGKey(0)
    k_x, k_h, k_p = jax.random.split(key, 3)

    inputs = jax.random.normal(k_x, (batch, seq_len, input_size), dtype=jnp.float32)
    hidden0 = jax.random.normal(k_h, (1, batch, hidden_size), dtype=jnp.float32)
    params = init_params(k_p, input_size, hidden_size)

    outputs, final_hidden = gru_forward(inputs, hidden0, params)
    outputs = jax.block_until_ready(outputs)
    final_hidden = jax.block_until_ready(final_hidden)

    ref_out, ref_hfin = gru_reference(inputs, hidden0, params)

    assert outputs.shape == (batch, seq_len, hidden_size)
    assert final_hidden.shape == (1, batch, hidden_size)
    # bf16 MXU operands (W_h, gates) vs the pure-f32 reference: loosened tolerance.
    assert jnp.allclose(outputs, ref_out, atol=3e-2, rtol=3e-2)
    assert jnp.allclose(final_hidden, ref_hfin, atol=3e-2, rtol=3e-2)

    print("KERNEL_OK")
</pallas_src>

<mosaic_0001>
module attributes {stable_mosaic.version = 11 : i64} {
  func.func @_gru_kernel(%arg0: i32, %arg1: i32, %arg2: memref<8x8x384xbf16, #tpu.memory_space<vmem>>, %arg3: memref<8x128xf32, #tpu.memory_space<vmem>>, %arg4: memref<128x384xbf16, #tpu.memory_space<any>>, %arg5: memref<1x128xf32, #tpu.memory_space<vmem>>, %arg6: memref<8x8x128xf32, #tpu.memory_space<vmem>>, %arg7: memref<8x128xf32, #tpu.memory_space<vmem>>, %arg8: memref<128x384xbf16, #tpu.memory_space<vmem>>, %arg9: memref<!tpu.dma_semaphore, #tpu.memory_space<semaphore_mem>>) attributes {dimension_semantics = [#tpu.dimension_semantics<parallel>, #tpu.dimension_semantics<arbitrary>], iteration_bounds = array<i64: 1, 1>, scalar_prefetch = 0 : i64, scratch_operands = 3 : i64, tpu.core_type = #tpu.core_type<tc>, window_params = [{transform_indices = @transform_0, window_bounds = array<i64: 8, 8, 384>}, {transform_indices = @transform_1, window_bounds = array<i64: 8, 128>}, {}, {pipeline_mode = #tpu.pipeline_mode<synchronous>, transform_indices = @transform_3, window_bounds = array<i64: 1, 128>}, {transform_indices = @transform_4, window_bounds = array<i64: 8, 8, 128>}]} {
    %c0_i32 = arith.constant 0 : i32
    %0 = arith.cmpi eq, %arg1, %c0_i32 : i32
    %1 = arith.extui %0 : i1 to i32
    %c0_i32_0 = arith.constant 0 : i32
    %2 = arith.cmpi ne, %1, %c0_i32_0 : i32
    scf.if %2 {
      tpu.enqueue_dma source(%arg4 : memref<128x384xbf16, #tpu.memory_space<any>>) target(%arg8 : memref<128x384xbf16, #tpu.memory_space<vmem>>) target_semaphore(%arg9 : memref<!tpu.dma_semaphore, #tpu.memory_space<semaphore_mem>>)
      tpu.wait_dma2 semaphore(%arg9 : memref<!tpu.dma_semaphore, #tpu.memory_space<semaphore_mem>>) src(%arg4 : memref<128x384xbf16, #tpu.memory_space<any>>) dst(%arg8 : memref<128x384xbf16, #tpu.memory_space<vmem>>)
      %c0_72 = arith.constant 0 : index
      %c0_73 = arith.constant 0 : index
      %281 = vector.load %arg3[%c0_72, %c0_73] : memref<8x128xf32, #tpu.memory_space<vmem>>, vector<8x128xf32>
      %c0_74 = arith.constant 0 : index
      %c0_75 = arith.constant 0 : index
      %282 = vector.load %arg7[%c0_74, %c0_75] : memref<8x128xf32, #tpu.memory_space<vmem>>, vector<8x128xf32>
      tpu.vector_store %arg7[%c0_74, %c0_75], %281 {strides = array<i32>} : memref<8x128xf32, #tpu.memory_space<vmem>>, vector<8x128xf32>,
    } else {
    }
    %c0 = arith.constant 0 : index
    %c0_1 = arith.constant 0 : index
    %3 = vector.load %arg8[%c0, %c0_1] : memref<128x384xbf16, #tpu.memory_space<vmem>>, vector<128x384xbf16>
    %c0_2 = arith.constant 0 : index
    %c0_3 = arith.constant 0 : index
    %4 = vector.load %arg5[%c0_2, %c0_3] : memref<1x128xf32, #tpu.memory_space<vmem>>, vector<1x128xf32>
    %5 = vector.shape_cast %4 : vector<1x128xf32> to vector<1x128xf32>
    %6 = vector.broadcast %5 : vector<1x128xf32> to vector<8x128xf32>
    %c0_4 = arith.constant 0 : index
    %c0_5 = arith.constant 0 : index
    %7 = vector.load %arg7[%c0_4, %c0_5] : memref<8x128xf32, #tpu.memory_space<vmem>>, vector<8x128xf32>
    %c0_6 = arith.constant 0 : index
    %c0_7 = arith.constant 0 : index
    %c0_8 = arith.constant 0 : index
    %8 = vector.load %arg2[%c0_6, %c0_7, %c0_8] : memref<8x8x384xbf16, #tpu.memory_space<vmem>>, vector<1x8x384xbf16>
    %9 = vector.shape_cast %8 : vector<1x8x384xbf16> to vector<8x384xbf16>
    %10 = arith.truncf %7 : vector<8x128xf32> to vector<8x128xbf16>
    %cst = arith.constant dense<0.000000e+00> : vector<8x384xf32>
    %11 = tpu.matmul %10, %3, %cst {dimension_numbers = #tpu.dot_dimension_numbers<[1], [0], [0], [1], [0, 0, 1, 1], [], []>} : vector<8x128xbf16>, vector<128x384xbf16>, vector<8x384xf32> -> vector<8x384xf32>
    %12 = vector.extract_strided_slice %9 {offsets = [0, 0], sizes = [8, 128], strides = [1, 1]} : vector<8x384xbf16> to vector<8x128xbf16>
    %13 = vector.extract_strided_slice %11 {offsets = [0, 0], sizes = [8, 128], strides = [1, 1]} : vector<8x384xf32> to vector<8x128xf32>
    %14 = arith.extf %12 : vector<8x128xbf16> to vector<8x128xf32>
    %15 = arith.addf %14, %13 : vector<8x128xf32>
    %16 = arith.negf %15 : vector<8x128xf32>
    %17 = math.exp %16 : vector<8x128xf32>
    %cst_9 = arith.constant 1.000000e+00 : f32
    %18 = vector.broadcast %cst_9 : f32 to vector<8x128xf32>
    %19 = arith.addf %18, %17 : vector<8x128xf32>
    %20 = arith.divf %18, %19 : vector<8x128xf32>
    %21 = vector.extract_strided_slice %9 {offsets = [0, 128], sizes = [8, 128], strides = [1, 1]} : vector<8x384xbf16> to vector<8x128xbf16>
    %22 = vector.extract_strided_slice %11 {offsets = [0, 128], sizes = [8, 128], strides = [1, 1]} : vector<8x384xf32> to vector<8x128xf32>
    %23 = arith.extf %21 : vector<8x128xbf16> to vector<8x128xf32>
    %24 = arith.addf %23, %22 : vector<8x128xf32>
    %25 = arith.negf %24 : vector<8x128xf32>
    %26 = math.exp %25 : vector<8x128xf32>
    %cst_10 = arith.constant 1.000000e+00 : f32
    %27 = vector.broadcast %cst_10 : f32 to vector<8x128xf32>
    %28 = arith.addf %27, %26 : vector<8x128xf32>
    %29 = arith.divf %27, %28 : vector<8x128xf32>
    %30 = vector.extract_strided_slice %9 {offsets = [0, 256], sizes = [8, 128], strides = [1, 1]} : vector<8x384xbf16> to vector<8x128xbf16>
    %31 = vector.extract_strided_slice %11 {offsets = [0, 256], sizes = [8, 128], strides = [1, 1]} : vector<8x384xf32> to vector<8x128xf32>
    %32 = arith.addf %31, %6 : vector<8x128xf32>
    %33 = arith.mulf %20, %32 : vector<8x128xf32>
    %34 = arith.extf %30 : vector<8x128xbf16> to vector<8x128xf32>
    %35 = arith.addf %34, %33 : vector<8x128xf32>
    %36 = math.tanh %35 : vector<8x128xf32>
    %37 = arith.subf %7, %36 : vector<8x128xf32>
    %38 = arith.mulf %29, %37 : vector<8x128xf32>
    %39 = arith.addf %36, %38 : vector<8x128xf32>
    %40 = vector.shape_cast %39 : vector<8x128xf32> to vector<8x1x128xf32>
    %c0_11 = arith.constant 0 : index
    %c0_12 = arith.constant 0 : index
    %c0_13 = arith.constant 0 : index
    %41 = vector.load %arg6[%c0_11, %c0_12, %c0_13] : memref<8x8x128xf32, #tpu.memory_space<vmem>>, vector<8x1x128xf32>
    tpu.vector_store %arg6[%c0_11, %c0_12, %c0_13], %40 {strides = array<i32>} : memref<8x8x128xf32, #tpu.memory_space<vmem>>, vector<8x1x128xf32>,
    %c1 = arith.constant 1 : index
    %c0_14 = arith.constant 0 : index
    %c0_15 = arith.constant 0 : index
    %42 = vector.load %arg2[%c1, %c0_14, %c0_15] : memref<8x8x384xbf16, #tpu.memory_space<vmem>>, vector<1x8x384xbf16>
    %43 = vector.shape_cast %42 : vector<1x8x384xbf16> to vector<8x384xbf16>
    %44 = arith.truncf %39 : vector<8x128xf32> to vector<8x128xbf16>
    %cst_16 = arith.constant dense<0.000000e+00> : vector<8x384xf32>
    %45 = tpu.matmul %44, %3, %cst_16 {dimension_numbers = #tpu.dot_dimension_numbers<[1], [0], [0], [1], [0, 0, 1, 1], [], []>} : vector<8x128xbf16>, vector<128x384xbf16>, vector<8x384xf32> -> vector<8x384xf32>
    %46 = vector.extract_strided_slice %43 {offsets = [0, 0], sizes = [8, 128], strides = [1, 1]} : vector<8x384xbf16> to vector<8x128xbf16>
    %47 = vector.extract_strided_slice %45 {offsets = [0, 0], sizes = [8, 128], strides = [1, 1]} : vector<8x384xf32> to vector<8x128xf32>
    %48 = arith.extf %46 : vector<8x128xbf16> to vector<8x128xf32>
    %49 = arith.addf %48, %47 : vector<8x128xf32>
    %50 = arith.negf %49 : vector<8x128xf32>
    %51 = math.exp %50 : vector<8x128xf32>
    %cst_17 = arith.constant 1.000000e+00 : f32
    %52 = vector.broadcast %cst_17 : f32 to vector<8x128xf32>
    %53 = arith.addf %52, %51 : vector<8x128xf32>
    %54 = arith.divf %52, %53 : vector<8x128xf32>
    %55 = vector.extract_strided_slice %43 {offsets = [0, 128], sizes = [8, 128], strides = [1, 1]} : vector<8x384xbf16> to vector<8x128xbf16>
    %56 = vector.extract_strided_slice %45 {offsets = [0, 128], sizes = [8, 128], strides = [1, 1]} : vector<8x384xf32> to vector<8x128xf32>
    %57 = arith.extf %55 : vector<8x128xbf16> to vector<8x128xf32>
    %58 = arith.addf %57, %56 : vector<8x128xf32>
    %59 = arith.negf %58 : vector<8x128xf32>
    %60 = math.exp %59 : vector<8x128xf32>
    %cst_18 = arith.constant 1.000000e+00 : f32
    %61 = vector.broadcast %cst_18 : f32 to vector<8x128xf32>
    %62 = arith.addf %61, %60 : vector<8x128xf32>
    %63 = arith.divf %61, %62 : vector<8x128xf32>
    %64 = vector.extract_strided_slice %43 {offsets = [0, 256], sizes = [8, 128], strides = [1, 1]} : vector<8x384xbf16> to vector<8x128xbf16>
    %65 = vector.extract_strided_slice %45 {offsets = [0, 256], sizes = [8, 128], strides = [1, 1]} : vector<8x384xf32> to vector<8x128xf32>
    %66 = arith.addf %65, %6 : vector<8x128xf32>
    %67 = arith.mulf %54, %66 : vector<8x128xf32>
    %68 = arith.extf %64 : vector<8x128xbf16> to vector<8x128xf32>
    %69 = arith.addf %68, %67 : vector<8x128xf32>
    %70 = math.tanh %69 : vector<8x128xf32>
    %71 = arith.subf %39, %70 : vector<8x128xf32>
    %72 = arith.mulf %63, %71 : vector<8x128xf32>
    %73 = arith.addf %70, %72 : vector<8x128xf32>
    %74 = vector.shape_cast %73 : vector<8x128xf32> to vector<8x1x128xf32>
    %c0_19 = arith.constant 0 : index
    %c1_20 = arith.constant 1 : index
    %c0_21 = arith.constant 0 : index
    %75 = vector.load %arg6[%c0_19, %c1_20, %c0_21] : memref<8x8x128xf32, #tpu.memory_space<vmem>>, vector<8x1x128xf32>
    tpu.vector_store %arg6[%c0_19, %c1_20, %c0_21], %74 {strides = array<i32>} : memref<8x8x128xf32, #tpu.memory_space<vmem>>, vector<8x1x128xf32>,
    %c2 = arith.constant 2 : index
    %c0_22 = arith.constant 0 : index
    %c0_23 = arith.constant 0 : index
    %76 = vector.load %arg2[%c2, %c0_22, %c0_23] : memref<8x8x384xbf16, #tpu.memory_space<vmem>>, vector<1x8x384xbf16>
    %77 = vector.shape_cast %76 : vector<1x8x384xbf16> to vector<8x384xbf16>
    %78 = arith.truncf %73 : vector<8x128xf32> to vector<8x128xbf16>
    %cst_24 = arith.constant dense<0.000000e+00> : vector<8x384xf32>
    %79 = tpu.matmul %78, %3, %cst_24 {dimension_numbers = #tpu.dot_dimension_numbers<[1], [0], [0], [1], [0, 0, 1, 1], [], []>} : vector<8x128xbf16>, vector<128x384xbf16>, vector<8x384xf32> -> vector<8x384xf32>
    %80 = vector.extract_strided_slice %77 {offsets = [0, 0], sizes = [8, 128], strides = [1, 1]} : vector<8x384xbf16> to vector<8x128xbf16>
    %81 = vector.extract_strided_slice %79 {offsets = [0, 0], sizes = [8, 128], strides = [1, 1]} : vector<8x384xf32> to vector<8x128xf32>
    %82 = arith.extf %80 : vector<8x128xbf16> to vector<8x128xf32>
    %83 = arith.addf %82, %81 : vector<8x128xf32>
    %84 = arith.negf %83 : vector<8x128xf32>
    %85 = math.exp %84 : vector<8x128xf32>
    %cst_25 = arith.constant 1.000000e+00 : f32
    %86 = vector.broadcast %cst_25 : f32 to vector<8x128xf32>
    %87 = arith.addf %86, %85 : vector<8x128xf32>
    %88 = arith.divf %86, %87 : vector<8x128xf32>
    %89 = vector.extract_strided_slice %77 {offsets = [0, 128], sizes = [8, 128], strides = [1, 1]} : vector<8x384xbf16> to vector<8x128xbf16>
    %90 = vector.extract_strided_slice %79 {offsets = [0, 128], sizes = [8, 128], strides = [1, 1]} : vector<8x384xf32> to vector<8x128xf32>
    %91 = arith.extf %89 : vector<8x128xbf16> to vector<8x128xf32>
    %92 = arith.addf %91, %90 : vector<8x128xf32>
    %93 = arith.negf %92 : vector<8x128xf32>
    %94 = math.exp %93 : vector<8x128xf32>
    %cst_26 = arith.constant 1.000000e+00 : f32
    %95 = vector.broadcast %cst_26 : f32 to vector<8x128xf32>
    %96 = arith.addf %95, %94 : vector<8x128xf32>
    %97 = arith.divf %95, %96 : vector<8x128xf32>
    %98 = vector.extract_strided_slice %77 {offsets = [0, 256], sizes = [8, 128], strides = [1, 1]} : vector<8x384xbf16> to vector<8x128xbf16>
    %99 = vector.extract_strided_slice %79 {offsets = [0, 256], sizes = [8, 128], strides = [1, 1]} : vector<8x384xf32> to vector<8x128xf32>
    %100 = arith.addf %99, %6 : vector<8x128xf32>
    %101 = arith.mulf %88, %100 : vector<8x128xf32>
    %102 = arith.extf %98 : vector<8x128xbf16> to vector<8x128xf32>
    %103 = arith.addf %102, %101 : vector<8x128xf32>
    %104 = math.tanh %103 : vector<8x128xf32>
    %105 = arith.subf %73, %104 : vector<8x128xf32>
    %106 = arith.mulf %97, %105 : vector<8x128xf32>
    %107 = arith.addf %104, %106 : vector<8x128xf32>
    %108 = vector.shape_cast %107 : vector<8x128xf32> to vector<8x1x128xf32>
    %c0_27 = arith.constant 0 : index
    %c2_28 = arith.constant 2 : index
    %c0_29 = arith.constant 0 : index
    %109 = vector.load %arg6[%c0_27, %c2_28, %c0_29] : memref<8x8x128xf32, #tpu.memory_space<vmem>>, vector<8x1x128xf32>
    tpu.vector_store %arg6[%c0_27, %c2_28, %c0_29], %108 {strides = array<i32>} : memref<8x8x128xf32, #tpu.memory_space<vmem>>, vector<8x1x128xf32>,
    %c3 = arith.constant 3 : index
    %c0_30 = arith.constant 0 : index
    %c0_31 = arith.constant 0 : index
    %110 = vector.load %arg2[%c3, %c0_30, %c0_31] : memref<8x8x384xbf16, #tpu.memory_space<vmem>>, vector<1x8x384xbf16>
    %111 = vector.shape_cast %110 : vector<1x8x384xbf16> to vector<8x384xbf16>
    %112 = arith.truncf %107 : vector<8x128xf32> to vector<8x128xbf16>
    %cst_32 = arith.constant dense<0.000000e+00> : vector<8x384xf32>
    %113 = tpu.matmul %112, %3, %cst_32 {dimension_numbers = #tpu.dot_dimension_numbers<[1], [0], [0], [1], [0, 0, 1, 1], [], []>} : vector<8x128xbf16>, vector<128x384xbf16>, vector<8x384xf32> -> vector<8x384xf32>
    %114 = vector.extract_strided_slice %111 {offsets = [0, 0], sizes = [8, 128], strides = [1, 1]} : vector<8x384xbf16> to vector<8x128xbf16>
    %115 = vector.extract_strided_slice %113 {offsets = [0, 0], sizes = [8, 128], strides = [1, 1]} : vector<8x384xf32> to vector<8x128xf32>
    %116 = arith.extf %114 : vector<8x128xbf16> to vector<8x128xf32>
    %117 = arith.addf %116, %115 : vector<8x128xf32>
    %118 = arith.negf %117 : vector<8x128xf32>
    %119 = math.exp %118 : vector<8x128xf32>
    %cst_33 = arith.constant 1.000000e+00 : f32
    %120 = vector.broadcast %cst_33 : f32 to vector<8x128xf32>
    %121 = arith.addf %120, %119 : vector<8x128xf32>
    %122 = arith.divf %120, %121 : vector<8x128xf32>
    %123 = vector.extract_strided_slice %111 {offsets = [0, 128], sizes = [8, 128], strides = [1, 1]} : vector<8x384xbf16> to vector<8x128xbf16>
    %124 = vector.extract_strided_slice %113 {offsets = [0, 128], sizes = [8, 128], strides = [1, 1]} : vector<8x384xf32> to vector<8x128xf32>
    %125 = arith.extf %123 : vector<8x128xbf16> to vector<8x128xf32>
    %126 = arith.addf %125, %124 : vector<8x128xf32>
    %127 = arith.negf %126 : vector<8x128xf32>
    %128 = math.exp %127 : vector<8x128xf32>
    %cst_34 = arith.constant 1.000000e+00 : f32
    %129 = vector.broadcast %cst_34 : f32 to vector<8x128xf32>
    %130 = arith.addf %129, %128 : vector<8x128xf32>
    %131 = arith.divf %129, %130 : vector<8x128xf32>
    %132 = vector.extract_strided_slice %111 {offsets = [0, 256], sizes = [8, 128], strides = [1, 1]} : vector<8x384xbf16> to vector<8x128xbf16>
    %133 = vector.extract_strided_slice %113 {offsets = [0, 256], sizes = [8, 128], strides = [1, 1]} : vector<8x384xf32> to vector<8x128xf32>
    %134 = arith.addf %133, %6 : vector<8x128xf32>
    %135 = arith.mulf %122, %134 : vector<8x128xf32>
    %136 = arith.extf %132 : vector<8x128xbf16> to vector<8x128xf32>
    %137 = arith.addf %136, %135 : vector<8x128xf32>
    %138 = math.tanh %137 : vector<8x128xf32>
    %139 = arith.subf %107, %138 : vector<8x128xf32>
    %140 = arith.mulf %131, %139 : vector<8x128xf32>
    %141 = arith.addf %138, %140 : vector<8x128xf32>
    %142 = vector.shape_cast %141 : vector<8x128xf32> to vector<8x1x128xf32>
    %c0_35 = arith.constant 0 : index
    %c3_36 = arith.constant 3 : index
    %c0_37 = arith.constant 0 : index
    %143 = vector.load %arg6[%c0_35, %c3_36, %c0_37] : memref<8x8x128xf32, #tpu.memory_space<vmem>>, vector<8x1x128xf32>
    tpu.vector_store %arg6[%c0_35, %c3_36, %c0_37], %142 {strides = array<i32>} : memref<8x8x128xf32, #tpu.memory_space<vmem>>, vector<8x1x128xf32>,
    %c4 = arith.constant 4 : index
    %c0_38 = arith.constant 0 : index
    %c0_39 = arith.constant 0 : index
    %144 = vector.load %arg2[%c4, %c0_38, %c0_39] : memref<8x8x384xbf16, #tpu.memory_space<vmem>>, vector<1x8x384xbf16>
    %145 = vector.shape_cast %144 : vector<1x8x384xbf16> to vector<8x384xbf16>
    %146 = arith.truncf %141 : vector<8x128xf32> to vector<8x128xbf16>
    %cst_40 = arith.constant dense<0.000000e+00> : vector<8x384xf32>
    %147 = tpu.matmul %146, %3, %cst_40 {dimension_numbers = #tpu.dot_dimension_numbers<[1], [0], [0], [1], [0, 0, 1, 1], [], []>} : vector<8x128xbf16>, vector<128x384xbf16>, vector<8x384xf32> -> vector<8x384xf32>
    %148 = vector.extract_strided_slice %145 {offsets = [0, 0], sizes = [8, 128], strides = [1, 1]} : vector<8x384xbf16> to vector<8x128xbf16>
    %149 = vector.extract_strided_slice %147 {offsets = [0, 0], sizes = [8, 128], strides = [1, 1]} : vector<8x384xf32> to vector<8x128xf32>
    %150 = arith.extf %148 : vector<8x128xbf16> to vector<8x128xf32>
    %151 = arith.addf %150, %149 : vector<8x128xf32>
    %152 = arith.negf %151 : vector<8x128xf32>
    %153 = math.exp %152 : vector<8x128xf32>
    %cst_41 = arith.constant 1.000000e+00 : f32
    %154 = vector.broadcast %cst_41 : f32 to vector<8x128xf32>
    %155 = arith.addf %154, %153 : vector<8x128xf32>
    %156 = arith.divf %154, %155 : vector<8x128xf32>
    %157 = vector.extract_strided_slice %145 {offsets = [0, 128], sizes = [8, 128], strides = [1, 1]} : vector<8x384xbf16> to vector<8x128xbf16>
    %158 = vector.extract_strided_slice %147 {offsets = [0, 128], sizes = [8, 128], strides = [1, 1]} : vector<8x384xf32> to vector<8x128xf32>
    %159 = arith.extf %157 : vector<8x128xbf16> to vector<8x128xf32>
    %160 = arith.addf %159, %158 : vector<8x128xf32>
    %161 = arith.negf %160 : vector<8x128xf32>
    %162 = math.exp %161 : vector<8x128xf32>
    %cst_42 = arith.constant 1.000000e+00 : f32
    %163 = vector.broadcast %cst_42 : f32 to vector<8x128xf32>
    %164 = arith.addf %163, %162 : vector<8x128xf32>
    %165 = arith.divf %163, %164 : vector<8x128xf32>
    %166 = vector.extract_strided_slice %145 {offsets = [0, 256], sizes = [8, 128], strides = [1, 1]} : vector<8x384xbf16> to vector<8x128xbf16>
    %167 = vector.extract_strided_slice %147 {offsets = [0, 256], sizes = [8, 128], strides = [1, 1]} : vector<8x384xf32> to vector<8x128xf32>
    %168 = arith.addf %167, %6 : vector<8x128xf32>
    %169 = arith.mulf %156, %168 : vector<8x128xf32>
    %170 = arith.extf %166 : vector<8x128xbf16> to vector<8x128xf32>
    %171 = arith.addf %170, %169 : vector<8x128xf32>
    %172 = math.tanh %171 : vector<8x128xf32>
    %173 = arith.subf %141, %172 : vector<8x128xf32>
    %174 = arith.mulf %165, %173 : vector<8x128xf32>
    %175 = arith.addf %172, %174 : vector<8x128xf32>
    %176 = vector.shape_cast %175 : vector<8x128xf32> to vector<8x1x128xf32>
    %c0_43 = arith.constant 0 : index
    %c4_44 = arith.constant 4 : index
    %c0_45 = arith.constant 0 : index
    %177 = vector.load %arg6[%c0_43, %c4_44, %c0_45] : memref<8x8x128xf32, #tpu.memory_space<vmem>>, vector<8x1x128xf32>
    tpu.vector_store %arg6[%c0_43, %c4_44, %c0_45], %176 {strides = array<i32>} : memref<8x8x128xf32, #tpu.memory_space<vmem>>, vector<8x1x128xf32>,
    %c5 = arith.constant 5 : index
    %c0_46 = arith.constant 0 : index
    %c0_47 = arith.constant 0 : index
    %178 = vector.load %arg2[%c5, %c0_46, %c0_47] : memref<8x8x384xbf16, #tpu.memory_space<vmem>>, vector<1x8x384xbf16>
    %179 = vector.shape_cast %178 : vector<1x8x384xbf16> to vector<8x384xbf16>
    %180 = arith.truncf %175 : vector<8x128xf32> to vector<8x128xbf16>
    %cst_48 = arith.constant dense<0.000000e+00> : vector<8x384xf32>
    %181 = tpu.matmul %180, %3, %cst_48 {dimension_numbers = #tpu.dot_dimension_numbers<[1], [0], [0], [1], [0, 0, 1, 1], [], []>} : vector<8x128xbf16>, vector<128x384xbf16>, vector<8x384xf32> -> vector<8x384xf32>
    %182 = vector.extract_strided_slice %179 {offsets = [0, 0], sizes = [8, 128], strides = [1, 1]} : vector<8x384xbf16> to vector<8x128xbf16>
    %183 = vector.extract_strided_slice %181 {offsets = [0, 0], sizes = [8, 128], strides = [1, 1]} : vector<8x384xf32> to vector<8x128xf32>
    %184 = arith.extf %182 : vector<8x128xbf16> to vector<8x128xf32>
    %185 = arith.addf %184, %183 : vector<8x128xf32>
    %186 = arith.negf %185 : vector<8x128xf32>
    %187 = math.exp %186 : vector<8x128xf32>
    %cst_49 = arith.constant 1.000000e+00 : f32
    %188 = vector.broadcast %cst_49 : f32 to vector<8x128xf32>
    %189 = arith.addf %188, %187 : vector<8x128xf32>
    %190 = arith.divf %188, %189 : vector<8x128xf32>
    %191 = vector.extract_strided_slice %179 {offsets = [0, 128], sizes = [8, 128], strides = [1, 1]} : vector<8x384xbf16> to vector<8x128xbf16>
    %192 = vector.extract_strided_slice %181 {offsets = [0, 128], sizes = [8, 128], strides = [1, 1]} : vector<8x384xf32> to vector<8x128xf32>
    %193 = arith.extf %191 : vector<8x128xbf16> to vector<8x128xf32>
    %194 = arith.addf %193, %192 : vector<8x128xf32>
    %195 = arith.negf %194 : vector<8x128xf32>
    %196 = math.exp %195 : vector<8x128xf32>
    %cst_50 = arith.constant 1.000000e+00 : f32
    %197 = vector.broadcast %cst_50 : f32 to vector<8x128xf32>
    %198 = arith.addf %197, %196 : vector<8x128xf32>
    %199 = arith.divf %197, %198 : vector<8x128xf32>
    %200 = vector.extract_strided_slice %179 {offsets = [0, 256], sizes = [8, 128], strides = [1, 1]} : vector<8x384xbf16> to vector<8x128xbf16>
    %201 = vector.extract_strided_slice %181 {offsets = [0, 256], sizes = [8, 128], strides = [1, 1]} : vector<8x384xf32> to vector<8x128xf32>
    %202 = arith.addf %201, %6 : vector<8x128xf32>
    %203 = arith.mulf %190, %202 : vector<8x128xf32>
    %204 = arith.extf %200 : vector<8x128xbf16> to vector<8x128xf32>
    %205 = arith.addf %204, %203 : vector<8x128xf32>
    %206 = math.tanh %205 : vector<8x128xf32>
    %207 = arith.subf %175, %206 : vector<8x128xf32>
    %208 = arith.mulf %199, %207 : vector<8x128xf32>
    %209 = arith.addf %206, %208 : vector<8x128xf32>
    %210 = vector.shape_cast %209 : vector<8x128xf32> to vector<8x1x128xf32>
    %c0_51 = arith.constant 0 : index
    %c5_52 = arith.constant 5 : index
    %c0_53 = arith.constant 0 : index
    %211 = vector.load %arg6[%c0_51, %c5_52, %c0_53] : memref<8x8x128xf32, #tpu.memory_space<vmem>>, vector<8x1x128xf32>
    tpu.vector_store %arg6[%c0_51, %c5_52, %c0_53], %210 {strides = array<i32>} : memref<8x8x128xf32, #tpu.memory_space<vmem>>, vector<8x1x128xf32>,
    %c6 = arith.constant 6 : index
    %c0_54 = arith.constant 0 : index
    %c0_55 = arith.constant 0 : index
    %212 = vector.load %arg2[%c6, %c0_54, %c0_55] : memref<8x8x384xbf16, #tpu.memory_space<vmem>>, vector<1x8x384xbf16>
    %213 = vector.shape_cast %212 : vector<1x8x384xbf16> to vector<8x384xbf16>
    %214 = arith.truncf %209 : vector<8x128xf32> to vector<8x128xbf16>
    %cst_56 = arith.constant dense<0.000000e+00> : vector<8x384xf32>
    %215 = tpu.matmul %214, %3, %cst_56 {dimension_numbers = #tpu.dot_dimension_numbers<[1], [0], [0], [1], [0, 0, 1, 1], [], []>} : vector<8x128xbf16>, vector<128x384xbf16>, vector<8x384xf32> -> vector<8x384xf32>
    %216 = vector.extract_strided_slice %213 {offsets = [0, 0], sizes = [8, 128], strides = [1, 1]} : vector<8x384xbf16> to vector<8x128xbf16>
    %217 = vector.extract_strided_slice %215 {offsets = [0, 0], sizes = [8, 128], strides = [1, 1]} : vector<8x384xf32> to vector<8x128xf32>
    %218 = arith.extf %216 : vector<8x128xbf16> to vector<8x128xf32>
    %219 = arith.addf %218, %217 : vector<8x128xf32>
    %220 = arith.negf %219 : vector<8x128xf32>
    %221 = math.exp %220 : vector<8x128xf32>
    %cst_57 = arith.constant 1.000000e+00 : f32
    %222 = vector.broadcast %cst_57 : f32 to vector<8x128xf32>
    %223 = arith.addf %222, %221 : vector<8x128xf32>
    %224 = arith.divf %222, %223 : vector<8x128xf32>
    %225 = vector.extract_strided_slice %213 {offsets = [0, 128], sizes = [8, 128], strides = [1, 1]} : vector<8x384xbf16> to vector<8x128xbf16>
    %226 = vector.extract_strided_slice %215 {offsets = [0, 128], sizes = [8, 128], strides = [1, 1]} : vector<8x384xf32> to vector<8x128xf32>
    %227 = arith.extf %225 : vector<8x128xbf16> to vector<8x128xf32>
    %228 = arith.addf %227, %226 : vector<8x128xf32>
    %229 = arith.negf %228 : vector<8x128xf32>
    %230 = math.exp %229 : vector<8x128xf32>
    %cst_58 = arith.constant 1.000000e+00 : f32
    %231 = vector.broadcast %cst_58 : f32 to vector<8x128xf32>
    %232 = arith.addf %231, %230 : vector<8x128xf32>
    %233 = arith.divf %231, %232 : vector<8x128xf32>
    %234 = vector.extract_strided_slice %213 {offsets = [0, 256], sizes = [8, 128], strides = [1, 1]} : vector<8x384xbf16> to vector<8x128xbf16>
    %235 = vector.extract_strided_slice %215 {offsets = [0, 256], sizes = [8, 128], strides = [1, 1]} : vector<8x384xf32> to vector<8x128xf32>
    %236 = arith.addf %235, %6 : vector<8x128xf32>
    %237 = arith.mulf %224, %236 : vector<8x128xf32>
    %238 = arith.extf %234 : vector<8x128xbf16> to vector<8x128xf32>
    %239 = arith.addf %238, %237 : vector<8x128xf32>
    %240 = math.tanh %239 : vector<8x128xf32>
    %241 = arith.subf %209, %240 : vector<8x128xf32>
    %242 = arith.mulf %233, %241 : vector<8x128xf32>
    %243 = arith.addf %240, %242 : vector<8x128xf32>
    %244 = vector.shape_cast %243 : vector<8x128xf32> to vector<8x1x128xf32>
    %c0_59 = arith.constant 0 : index
    %c6_60 = arith.constant 6 : index
    %c0_61 = arith.constant 0 : index
    %245 = vector.load %arg6[%c0_59, %c6_60, %c0_61] : memref<8x8x128xf32, #tpu.memory_space<vmem>>, vector<8x1x128xf32>
    tpu.vector_store %arg6[%c0_59, %c6_60, %c0_61], %244 {strides = array<i32>} : memref<8x8x128xf32, #tpu.memory_space<vmem>>, vector<8x1x128xf32>,
    %c7 = arith.constant 7 : index
    %c0_62 = arith.constant 0 : index
    %c0_63 = arith.constant 0 : index
    %246 = vector.load %arg2[%c7, %c0_62, %c0_63] : memref<8x8x384xbf16, #tpu.memory_space<vmem>>, vector<1x8x384xbf16>
    %247 = vector.shape_cast %246 : vector<1x8x384xbf16> to vector<8x384xbf16>
    %248 = arith.truncf %243 : vector<8x128xf32> to vector<8x128xbf16>
    %cst_64 = arith.constant dense<0.000000e+00> : vector<8x384xf32>
    %249 = tpu.matmul %248, %3, %cst_64 {dimension_numbers = #tpu.dot_dimension_numbers<[1], [0], [0], [1], [0, 0, 1, 1], [], []>} : vector<8x128xbf16>, vector<128x384xbf16>, vector<8x384xf32> -> vector<8x384xf32>
    %250 = vector.extract_strided_slice %247 {offsets = [0, 0], sizes = [8, 128], strides = [1, 1]} : vector<8x384xbf16> to vector<8x128xbf16>
    %251 = vector.extract_strided_slice %249 {offsets = [0, 0], sizes = [8, 128], strides = [1, 1]} : vector<8x384xf32> to vector<8x128xf32>
    %252 = arith.extf %250 : vector<8x128xbf16> to vector<8x128xf32>
    %253 = arith.addf %252, %251 : vector<8x128xf32>
    %254 = arith.negf %253 : vector<8x128xf32>
    %255 = math.exp %254 : vector<8x128xf32>
    %cst_65 = arith.constant 1.000000e+00 : f32
    %256 = vector.broadcast %cst_65 : f32 to vector<8x128xf32>
    %257 = arith.addf %256, %255 : vector<8x128xf32>
    %258 = arith.divf %256, %257 : vector<8x128xf32>
    %259 = vector.extract_strided_slice %247 {offsets = [0, 128], sizes = [8, 128], strides = [1, 1]} : vector<8x384xbf16> to vector<8x128xbf16>
    %260 = vector.extract_strided_slice %249 {offsets = [0, 128], sizes = [8, 128], strides = [1, 1]} : vector<8x384xf32> to vector<8x128xf32>
    %261 = arith.extf %259 : vector<8x128xbf16> to vector<8x128xf32>
    %262 = arith.addf %261, %260 : vector<8x128xf32>
    %263 = arith.negf %262 : vector<8x128xf32>
    %264 = math.exp %263 : vector<8x128xf32>
    %cst_66 = arith.constant 1.000000e+00 : f32
    %265 = vector.broadcast %cst_66 : f32 to vector<8x128xf32>
    %266 = arith.addf %265, %264 : vector<8x128xf32>
    %267 = arith.divf %265, %266 : vector<8x128xf32>
    %268 = vector.extract_strided_slice %247 {offsets = [0, 256], sizes = [8, 128], strides = [1, 1]} : vector<8x384xbf16> to vector<8x128xbf16>
    %269 = vector.extract_strided_slice %249 {offsets = [0, 256], sizes = [8, 128], strides = [1, 1]} : vector<8x384xf32> to vector<8x128xf32>
    %270 = arith.addf %269, %6 : vector<8x128xf32>
    %271 = arith.mulf %258, %270 : vector<8x128xf32>
    %272 = arith.extf %268 : vector<8x128xbf16> to vector<8x128xf32>
    %273 = arith.addf %272, %271 : vector<8x128xf32>
    %274 = math.tanh %273 : vector<8x128xf32>
    %275 = arith.subf %243, %274 : vector<8x128xf32>
    %276 = arith.mulf %267, %275 : vector<8x128xf32>
    %277 = arith.addf %274, %276 : vector<8x128xf32>
    %278 = vector.shape_cast %277 : vector<8x128xf32> to vector<8x1x128xf32>
    %c0_67 = arith.constant 0 : index
    %c7_68 = arith.constant 7 : index
    %c0_69 = arith.constant 0 : index
    %279 = vector.load %arg6[%c0_67, %c7_68, %c0_69] : memref<8x8x128xf32, #tpu.memory_space<vmem>>, vector<8x1x128xf32>
    tpu.vector_store %arg6[%c0_67, %c7_68, %c0_69], %278 {strides = array<i32>} : memref<8x8x128xf32, #tpu.memory_space<vmem>>, vector<8x1x128xf32>,
    %c0_70 = arith.constant 0 : index
    %c0_71 = arith.constant 0 : index
    %280 = vector.load %arg7[%c0_70, %c0_71] : memref<8x128xf32, #tpu.memory_space<vmem>>, vector<8x128xf32>
    tpu.vector_store %arg7[%c0_70, %c0_71], %277 {strides = array<i32>} : memref<8x128xf32, #tpu.memory_space<vmem>>, vector<8x128xf32>,
    return
  }
  func.func @transform_0(%arg0: i32, %arg1: i32) -> (i32, i32, i32) {
    %c0_i32 = arith.constant 0 : i32
    %c0_i32_0 = arith.constant 0 : i32
    return %arg1, %arg0, %c0_i32 : i32, i32, i32
  }
  func.func @transform_1(%arg0: i32, %arg1: i32) -> (i32, i32) {
    %c0_i32 = arith.constant 0 : i32
    %c0_i32_0 = arith.constant 0 : i32
    return %arg0, %c0_i32 : i32, i32
  }
  func.func @transform_3(%arg0: i32, %arg1: i32) -> (i32, i32) {
    %c0_i32 = arith.constant 0 : i32
    %c0_i32_0 = arith.constant 0 : i32
    %c0_i32_1 = arith.constant 0 : i32
    return %c0_i32, %c0_i32_0 : i32, i32
  }
  func.func @transform_4(%arg0: i32, %arg1: i32) -> (i32, i32, i32) {
    %c0_i32 = arith.constant 0 : i32
    %c0_i32_0 = arith.constant 0 : i32
    return %arg0, %arg1, %c0_i32 : i32, i32, i32
  }
}

</mosaic_0001>

<bundles_post_ra>
// kernel: gru_forward.1
= control target key start
LH: loop header
LB: loop body
LE: loop exit
PB: predicated region body
PF: predicated region fallthrough
CT: control target
= control target key end

     0   :  { %s3042_s0 = inlined_call_operand.vmem [shape: bf16[8,8,384], index: 0, kind: input, shape index: {}]   ;;  %s3043_s1 = inlined_call_operand.vmem [shape: f32[8,128], index: 1, kind: input, shape index: {}]   ;;  %s3044_s2 = inlined_call_operand.vmem [shape: bf16[128,384], index: 2, kind: input, shape index: {}]   ;;  %s3045_s3 = inlined_call_operand.vmem [shape: f32[1,128], index: 3, kind: input, shape index: {}]   ;;  %s3046_s4 = inlined_call_operand.vmem [shape: f32[8,8,128], index: 4, kind: output, shape index: {}]  }
   0x1   :  { %v37_v0 = vld [vmem:[%s3044_s2] sm:$0xf]  ;;  %v39_v1 = vld [vmem:[%s3044_s2 + $0xc] sm:$0xf]  ;;  %v41_v2 = vld [vmem:[%s3044_s2 + $0x4] sm:$0xf] }
   0x2   :  { %38 = vst [vmem:[#allocation3] sm:$0xf] %v37_v0  ;;  %40 = vst [vmem:[#allocation3 + $0x4] sm:$0xf] %v39_v1  ;;  %v43_v3 = vld [vmem:[%s3044_s2 + $0x10] sm:$0xf] }
   0x3   :  { %42 = vst [vmem:[#allocation3 + $0x8] sm:$0xf] %v41_v2  ;;  %v45_v4 = vld [vmem:[%s3044_s2 + $0x8] sm:$0xf]  ;;  %v47_v5 = vld [vmem:[%s3044_s2 + $0x14] sm:$0xff]   ;;  %v59_v10 = vld [vmem:[%s3044_s2 + $0x2c] sm:$0xff]  }
   0x4   :  { %44 = vst [vmem:[#allocation3 + $0xc] sm:$0xf] %v43_v3  ;;  %46 = vst [vmem:[#allocation3 + $0x10] sm:$0xf] %v45_v4  ;;  %v51_v6 = vld [vmem:[%s3044_s2 + $0x24] sm:$0xf] }
   0x5   :  { %48 = vst [vmem:[#allocation3 + $0x14] sm:$0xff] %v47_v5   ;;  %v53_v7 = vld [vmem:[%s3044_s2 + $0x1c] sm:$0xf]  ;;  %v55_v8 = vld [vmem:[%s3044_s2 + $0x28] sm:$0xf]  ;;  %60 = vst [vmem:[#allocation3 + $0x2c] sm:$0xff] %v59_v10  }
   0x6   :  { %52 = vst [vmem:[#allocation3 + $0x1c] sm:$0xf] %v51_v6  ;;  %54 = vst [vmem:[#allocation3 + $0x20] sm:$0xf] %v53_v7  ;;  %v57_v9 = vld [vmem:[%s3044_s2 + $0x20] sm:$0xf] }
   0x7   :  { %56 = vst [vmem:[#allocation3 + $0x24] sm:$0xf] %v55_v8  ;;  %v63_v11 = vld [vmem:[%s3044_s2 + $0x3c] sm:$0xf]  ;;  %58 = vst [vmem:[#allocation3 + $0x28] sm:$0xf] %v57_v9 }
   0x8   :  { %64 = vst [vmem:[#allocation3 + $0x34] sm:$0xf] %v63_v11  ;;  %v65_v12 = vld [vmem:[%s3044_s2 + $0x34] sm:$0xf]  ;;  %v67_v13 = vld [vmem:[%s3044_s2 + $0x40] sm:$0xf] }
   0x9   :  { %v69_v14 = vld [vmem:[%s3044_s2 + $0x38] sm:$0xf]  ;;  %66 = vst [vmem:[#allocation3 + $0x38] sm:$0xf] %v65_v12  ;;  %68 = vst [vmem:[#allocation3 + $0x3c] sm:$0xf] %v67_v13 }
   0xa   :  { %70 = vst [vmem:[#allocation3 + $0x40] sm:$0xf] %v69_v14  ;;  %v71_v15 = vld [vmem:[%s3044_s2 + $0x44] sm:$0xff]   ;;  %v75_v16 = vld [vmem:[%s3044_s2 + $0x54] sm:$0xf]  ;;  %v83_v20 = vld [vmem:[%s3044_s2 + $0x5c] sm:$0xff]  }
   0xb   :  { %v77_v17 = vld [vmem:[%s3044_s2 + $0x4c] sm:$0xf]  ;;  %72 = vst [vmem:[#allocation3 + $0x44] sm:$0xff] %v71_v15   ;;  %76 = vst [vmem:[#allocation3 + $0x4c] sm:$0xf] %v75_v16  ;;  %v95_v25 = vld [vmem:[%s3044_s2 + $0x74] sm:$0xff]  }
   0xc   :  { %78 = vst [vmem:[#allocation3 + $0x50] sm:$0xf] %v77_v17  ;;  %v79_v18 = vld [vmem:[%s3044_s2 + $0x58] sm:$0xf]  ;;  %v81_v19 = vld [vmem:[%s3044_s2 + $0x50] sm:$0xf] }
   0xd   :  { %80 = vst [vmem:[#allocation3 + $0x54] sm:$0xf] %v79_v18  ;;  %82 = vst [vmem:[#allocation3 + $0x58] sm:$0xf] %v81_v19  ;;  %v87_v21 = vld [vmem:[%s3044_s2 + $0x6c] sm:$0xf] }
   0xe   :  { %84 = vst [vmem:[#allocation3 + $0x5c] sm:$0xff] %v83_v20   ;;  %v89_v22 = vld [vmem:[%s3044_s2 + $0x64] sm:$0xf]  ;;  %v91_v23 = vld [vmem:[%s3044_s2 + $0x70] sm:$0xf]  ;;  %96 = vst [vmem:[#allocation3 + $0x74] sm:$0xff] %v95_v25  }
   0xf   :  { %88 = vst [vmem:[#allocation3 + $0x64] sm:$0xf] %v87_v21  ;;  %90 = vst [vmem:[#allocation3 + $0x68] sm:$0xf] %v89_v22  ;;  %v93_v24 = vld [vmem:[%s3044_s2 + $0x68] sm:$0xf] }
  0x10   :  { %92 = vst [vmem:[#allocation3 + $0x6c] sm:$0xf] %v91_v23  ;;  %v99_v26 = vld [vmem:[%s3044_s2 + $0x84] sm:$0xf]  ;;  %94 = vst [vmem:[#allocation3 + $0x70] sm:$0xf] %v93_v24 }
  0x11   :  { %100 = vst [vmem:[#allocation3 + $0x7c] sm:$0xf] %v99_v26  ;;  %v101_v27 = vld [vmem:[%s3044_s2 + $0x7c] sm:$0xf]  ;;  %v103_v28 = vld [vmem:[%s3044_s2 + $0x88] sm:$0xf] }
  0x12   :  { %v105_v29 = vld [vmem:[%s3044_s2 + $0x80] sm:$0xf]  ;;  %102 = vst [vmem:[#allocation3 + $0x80] sm:$0xf] %v101_v27  ;;  %104 = vst [vmem:[#allocation3 + $0x84] sm:$0xf] %v103_v28 }
  0x13   :  { %106 = vst [vmem:[#allocation3 + $0x88] sm:$0xf] %v105_v29  ;;  %v107_v30 = vld [vmem:[%s3044_s2 + $0x8c] sm:$0xff]   ;;  %v111_v31 = vld [vmem:[%s3044_s2 + $0x9c] sm:$0xf]  ;;  %v119_v35 = vld [vmem:[%s3044_s2 + $0xa4] sm:$0xff]  }
  0x14   :  { %v113_v32 = vld [vmem:[%s3044_s2 + $0x94] sm:$0xf]  ;;  %108 = vst [vmem:[#allocation3 + $0x8c] sm:$0xff] %v107_v30   ;;  %112 = vst [vmem:[#allocation3 + $0x94] sm:$0xf] %v111_v31 }
  0x15   :  { %114 = vst [vmem:[#allocation3 + $0x98] sm:$0xf] %v113_v32  ;;  %v115_v33 = vld [vmem:[%s3044_s2 + $0xa0] sm:$0xf]  ;;  %v117_v34 = vld [vmem:[%s3044_s2 + $0x98] sm:$0xf] }
  0x16   :  { %116 = vst [vmem:[#allocation3 + $0x9c] sm:$0xf] %v115_v33  ;;  %118 = vst [vmem:[#allocation3 + $0xa0] sm:$0xf] %v117_v34  ;;  %v123_v36 = vld [vmem:[%s3044_s2 + $0xb4] sm:$0xf] }
  0x17   :  { %120 = vst [vmem:[#allocation3 + $0xa4] sm:$0xff] %v119_v35   ;;  %v125_v37 = vld [vmem:[%s3044_s2 + $0xac] sm:$0xf]  ;;  %v127_v38 = vld [vmem:[%s3044_s2 + $0xb8] sm:$0xf] }
  0x18   :  { %124 = vst [vmem:[#allocation3 + $0xac] sm:$0xf] %v123_v36  ;;  %126 = vst [vmem:[#allocation3 + $0xb0] sm:$0xf] %v125_v37  ;;  %v129_v39 = vld [vmem:[%s3044_s2 + $0xb0] sm:$0xf] }
  0x19   :  { %128 = vst [vmem:[#allocation3 + $0xb4] sm:$0xf] %v127_v38  ;;  %v131_v40 = vld [vmem:[%s3044_s2 + $0xbc] sm:$0xf]  ;;  %130 = vst [vmem:[#allocation3 + $0xb8] sm:$0xf] %v129_v39 }
  0x1a   :  { %132 = vst [vmem:[#allocation3 + $0xbc] sm:$0xf] %v131_v40 }
  0x1b   :  { %259 = vsyncadd [#allocation4], 3072 }
  0x1c   :  { %2151 = dma.done.wait [#allocation4], 3072 }
  0x1d   :  { %2152 = vsyncadd [#allocation4], 4294964224  ;;  %v2153_v41 = vmov 0.0   ;;  %v2154_v42 = vmov 0   ;;  %vm2155_vm0 = vmmov 0   ;;  %v2309_v43 = vld [vmem:[#allocation3 + $0x8] sm:$0xff]  ;;  %v414_v34 = vlaneseq }
  0x1e   :  { %1882 = vmatprep.subr.bf16.mxu1 %v2153_v41  ;;  %333 = vmatprep.mubr.bf16.mxu0 %v2154_v42  ;;  %v2311_v44 = vld [vmem:[#allocation3] sm:$0xff]  ;;  %v2318_v46 = vld [vmem:[#allocation3 + $0x18] sm:$0xff]  ;;  %v2322_v48 = vld [vmem:[#allocation3 + $0x10] sm:$0xff]  ;;  %v2156_v32 = vmov 1966171168  }
  0x1f   :  { %1898 = vmatprep.mubr.msk.bf16.mxu1 %vm2155_vm0, %v2153_v41  ;;  %v2313_v45 = vld [vmem:[#allocation3 + $0x20] sm:$0xff]  ;;  %301 = vmatprep.subr.bf16.mxu0 %v2309_v43  ;;  %v2320_v47 = vld [vmem:[#allocation3 + $0x38] sm:$0xff]  ;;  %v2327_v49 = vld [vmem:[#allocation3 + $0x28] sm:$0xff]  ;;  %v412_v33 = vunpack.c.l.s4 %v2156_v32  ;;  %v415_v36 = vshrl.u32 %v414_v34, 7 }
  0x20   :  { %302 = vmatpush1.bf16.msra.mxu0 %v2311_v44  ;;  %1883 = vmatpush3.bf16.msra.mxu1 %v2322_v48  ;;  %v2330_v50 = vld [vmem:[#allocation3 + $0x30] sm:$0xff]  ;;  %v2337_v52 = vld [vmem:[#allocation3 + $0x40] sm:$0xff]  ;;  %v2340_v53 = vld [vmem:[#allocation3 + $0x48] sm:$0xff] }
  0x21   :  { %303 = vmatprep.subr.bf16.mxu0 %v2313_v45  ;;  %1884 = vmatprep.subr.bf16.mxu1 %v2153_v41  ;;  %v2332_v51 = vld [vmem:[#allocation3 + $0x50] sm:$0xff]  ;;  %v2342_v54 = vld [vmem:[#allocation3 + $0x68] sm:$0xff]  ;;  %v2347_v55 = vld [vmem:[#allocation3 + $0x58] sm:$0xff]  ;;  %v413_v35 = vunpack.c.0.s8 %v412_v33 }
  0x22   :  { %v2350_v56 = vld [vmem:[#allocation3 + $0x60] sm:$0xff]  ;;  %v2357_v58 = vld [vmem:[#allocation3 + $0x70] sm:$0xff]  ;;  %v2360_v59 = vld [vmem:[#allocation3 + $0x78] sm:$0xff] }
  0x23   :  { %v2352_v57 = vld [vmem:[#allocation3 + $0x80] sm:$0xff]  ;;  %v2362_v60 = vld [vmem:[#allocation3 + $0x98] sm:$0xff]  ;;  %v2367_v61 = vld [vmem:[#allocation3 + $0x88] sm:$0xff] }
  0x24   :  { %304 = vmatpush1.bf16.msra.mxu0 %v2318_v46  ;;  %1885 = vmatpush3.bf16.msra.mxu1 %v2327_v49  ;;  %v2370_v62 = vld [vmem:[#allocation3 + $0x90] sm:$0xff]  ;;  %v2379_v0 = vld [vmem:[%s3043_s1] sm:$0xff]  ;;  %v2385_v2 = vld [vmem:[#allocation3 + $0xa8] sm:$0xff] }
  0x25   :  { %305 = vmatprep.subr.bf16.mxu0 %v2320_v47  ;;  %1886 = vmatprep.subr.bf16.mxu1 %v2153_v41  ;;  %v2372_v63 = vld [vmem:[#allocation3 + $0xb0] sm:$0xff]  ;;  %v2382_v1 = vld [vmem:[#allocation3 + $0xa0] sm:$0xff]  ;;  %v300_v3 = vpack.c.bf16 %v2379_v0, %v2379_v0  ;;  %v2392_v4 = vld [vmem:[#allocation3 + $0xb8] sm:$0xff] }
  0x26   :  { %v298_v5 = vld [vmem:[%s3042_s0] sm:$0xff]  ;;  %v2443_v24 = vld [vmem:[%s3042_s0 + $0x8] ss:$12 sps:$4 sm:$0xff]  }
  0x27   :  { %v382_v6 = vunpack.c.l.bf16 %v298_v5  ;;  %v391_v10 = vrot.slane %v298_v5, 4  ;;  %v2438_v23 = vld [vmem:[%s3045_s3] ss:$0 sm:$0xff]  ;;  %v403_v27 = vunpack.c.l.bf16 %v2443_v24 }
  0x28   :  { %306 = vmatpush1.bf16.msra.mxu0 %v2330_v50  ;;  %1887 = vmatpush3.bf16.msra.mxu1 %v2337_v52 }
  0x29   :  { %307 = vmatprep.subr.bf16.mxu0 %v2332_v51  ;;  %1888 = vmatprep.subr.bf16.mxu1 %v2153_v41  ;;  %v393_v16 = vunpack.c.l.bf16 %v391_v10 }
  0x2c   :  { %308 = vmatpush1.bf16.msra.mxu0 %v2340_v53  ;;  %1889 = vmatpush3.bf16.msra.mxu1 %v2347_v55 }
  0x2d   :  { %309 = vmatprep.subr.bf16.mxu0 %v2342_v54  ;;  %1890 = vmatprep.subr.bf16.mxu1 %v2153_v41 }
  0x30   :  { %310 = vmatpush1.bf16.msra.mxu0 %v2350_v56  ;;  %1891 = vmatpush3.bf16.msra.mxu1 %v2357_v58 }
  0x31   :  { %311 = vmatprep.subr.bf16.mxu0 %v2352_v57  ;;  %1892 = vmatprep.subr.bf16.mxu1 %v2153_v41 }
  0x34   :  { %312 = vmatpush1.bf16.msra.mxu0 %v2360_v59  ;;  %1893 = vmatpush3.bf16.msra.mxu1 %v2367_v61 }
  0x35   :  { %313 = vmatprep.subr.bf16.mxu0 %v2362_v60  ;;  %1894 = vmatprep.subr.bf16.mxu1 %v2153_v41 }
  0x38   :  { %314 = vmatpush1.bf16.msra.mxu0 %v2370_v62  ;;  %1895 = vmatpush3.bf16.msra.mxu1 %v2382_v1 }
  0x39   :  { %315 = vmatprep.subr.bf16.mxu0 %v2372_v63  ;;  %1896 = vmatprep.subr.bf16.mxu1 %v2153_v41 }
  0x3c   :  { %316 = vmatpush1.bf16.msra.mxu0 %v2385_v2  ;;  %1897 = vmatpush3.bf16.msra.mxu1 %v2392_v4 }
  0x3d   :  { %479 = vmatprep.subr.bf16.mxu0 %v2309_v43  ;;  %1902 = vmatprep.subr.bf16.mxu1 %v2153_v41 }
  0x3f   :  { %334 = vmatmul.mubr.bf16.vlgmr.msra.gmra.mrb[0].mxu0 %v300_v3  ;;  %1899 = vmatmul.mubr.bf16.vlgmr.msra.gmra.mrb[0].mxu1 %v300_v3  ;;  %v2448_v3 = vsub.s32 %v413_v35, %v415_v36 }
  0x40   :  { %480 = vmatpush1.bf16.msra.mxu0 %v2311_v44  ;;  %511 = vmatprep.mubr.bf16.mxu0 %v2154_v42 }
  0x41   :  { %481 = vmatprep.subr.bf16.mxu0 %v2313_v45  ;;  %1903 = vmatpush3.bf16.msra.mxu1 %v2322_v48 }
  0x42   :  { %1918 = vmatprep.mubr.msk.bf16.mxu1 %vm2155_vm0, %v2153_v41  ;;  %1904 = vmatprep.subr.bf16.mxu1 %v2153_v41 }
  0x44   :  { %482 = vmatpush1.bf16.msra.mxu0 %v2318_v46 }
  0x45   :  { %483 = vmatprep.subr.bf16.mxu0 %v2320_v47  ;;  %1905 = vmatpush3.bf16.msra.mxu1 %v2327_v49 }
  0x46   :  { %1906 = vmatprep.subr.bf16.mxu1 %v2153_v41 }
  0x48   :  { %484 = vmatpush1.bf16.msra.mxu0 %v2330_v50 }
  0x49   :  { %485 = vmatprep.subr.bf16.mxu0 %v2332_v51  ;;  %1907 = vmatpush3.bf16.msra.mxu1 %v2337_v52 }
  0x4a   :  { %1908 = vmatprep.subr.bf16.mxu1 %v2153_v41 }
  0x4c   :  { %486 = vmatpush1.bf16.msra.mxu0 %v2340_v53 }
  0x4d   :  { %487 = vmatprep.subr.bf16.mxu0 %v2342_v54  ;;  %1909 = vmatpush3.bf16.msra.mxu1 %v2347_v55 }
  0x4e   :  { %1910 = vmatprep.subr.bf16.mxu1 %v2153_v41 }
  0x50   :  { %488 = vmatpush1.bf16.msra.mxu0 %v2350_v56 }
  0x51   :  { %489 = vmatprep.subr.bf16.mxu0 %v2352_v57  ;;  %1911 = vmatpush3.bf16.msra.mxu1 %v2357_v58 }
  0x52   :  { %1912 = vmatprep.subr.bf16.mxu1 %v2153_v41 }
  0x54   :  { %490 = vmatpush1.bf16.msra.mxu0 %v2360_v59 }
  0x55   :  { %491 = vmatprep.subr.bf16.mxu0 %v2362_v60  ;;  %1913 = vmatpush3.bf16.msra.mxu1 %v2367_v61 }
  0x56   :  { %1914 = vmatprep.subr.bf16.mxu1 %v2153_v41 }
  0x58   :  { %492 = vmatpush1.bf16.msra.mxu0 %v2370_v62 }
  0x59   :  { %493 = vmatprep.subr.bf16.mxu0 %v2372_v63  ;;  %1915 = vmatpush3.bf16.msra.mxu1 %v2382_v1 }
  0x5a   :  { %1916 = vmatprep.subr.bf16.mxu1 %v2153_v41 }
  0x5c   :  { %494 = vmatpush1.bf16.msra.mxu0 %v2385_v2 }
  0x5d   :  { %657 = vmatprep.subr.bf16.mxu0 %v2309_v43  ;;  %1917 = vmatpush3.bf16.msra.mxu1 %v2392_v4 }
  0x5e   :  { %1922 = vmatprep.subr.bf16.mxu1 %v2153_v41 }
 0x112   :  { %v335_v7 = vpop.f32.mrb[0].mxu0  ;;  %v376_v14 = vpop.f32.mrb[0].mxu1 }
 0x113   :  { %v383_v8 = vadd.f32 %v382_v6, %v335_v7  ;;  %v337_v9 = vpop.f32.mrb[1].mxu0  ;;  %v1900_v15 = vpop.f32.mrb[1].mxu1  ;;  %v401_v25 = vadd.f32 %v2438_v23, %v376_v14 }
 0x114   :  { %v339_v11 = vpop.f32.mrb[2].mxu0  ;;  %v379_v17 = vpop.f32.mrb[2].mxu1  ;;  %v394_v19 = vadd.f32 %v393_v16, %v337_v9 }
 0x115   :  { %v1747_v12 = vmul.f32 -1.442695, %v383_v8  ;;  %v340_v13 = vpop.f32.mrb[3].mxu0  ;;  %v1901_v18 = vpop.f32.mrb[3].mxu1 }
 0x116   :  { %v1748_v20 = vmul.f32 -1.442695, %v394_v19  ;;  %v1753_v19 = vld [vmem:[%s3042_s0 + $0xc] sm:$0xff] }
 0x117   :  { %2046 = vpow2.f32 %v1747_v12 }
 0x118   :  { %2048 = vpow2.f32 %v1748_v20  ;;  %v560_v20 = vunpack.c.l.bf16 %v1753_v19 }
 0x121   :  { %v2047_v21 = vpop.eup %2046 }
 0x122   :  { %v387_v22 = vadd.f32 1.0, %v2047_v21  ;;  %v2049_v26 = vpop.eup %2048 }
 0x123   :  { %v398_v30 = vadd.f32 1.0, %v2049_v26 }
 0x124   :  { %2050 = vrcp.f32 %v387_v22 }
 0x12e   :  { %v2051_v28 = vpop.eup %2050 }
 0x12f   :  { %v402_v29 = vmul.f32 %v2051_v28, %v401_v25 }
 0x131   :  { %v404_v31 = vadd.f32 %v403_v27, %v402_v29  ;;  %v569_v27 = vrot.slane %v1753_v19, 4 }
 0x133   :  { %2052 = vtanh.f32 %v404_v31  ;;  %v571_v34 = vunpack.c.l.bf16 %v569_v27 }
 0x134   :  { %2054 = vrcp.f32 %v398_v30 }
 0x13d   :  { %v2053_v37 = vpop.eup %2052 }
 0x13e   :  { %v406_v38 = vsub.f32 %v2379_v0, %v2053_v37  ;;  %v2055_v39 = vpop.eup %2054 }
 0x140   :  { %v407_v40 = vmul.f32 %v2055_v39, %v406_v38 }
 0x142   :  { %v2450_v5 = vadd.f32 %v2053_v37, %v407_v40 }
 0x144   :  { %v410_v6 = vcombine.high %v2450_v5, %v2450_v5  ;;  %v417_v7 = vrot.slane %v2450_v5, %v2448_v3  ;;  %v478_v8 = vpack.c.bf16 %v2450_v5, %v2450_v5 }
 0x146   :  { %v424_v9 = vrot.slane %v410_v6, %v2448_v3  ;;  %v425_v10 = vcombine.high %v417_v7, %v417_v7  ;;  %v433_v0 = vrot.slane %v417_v7, %v2448_v3  ;;  %1749 = vst.sshfl [vmem:[%s3046_s4] sm:$0x1 pattern:$0x73625140] %v417_v7  ;;  %512 = vmatmul.mubr.bf16.vlgmr.msra.gmra.mrb[4].mxu0 %v478_v8  ;;  %v581_v6 = vunpack.c.h.bf16 %v2443_v24 }
 0x147   :  { %1919 = vmatmul.mubr.bf16.vlgmr.msra.gmra.mrb[4].mxu1 %v478_v8  ;;  %658 = vmatpush1.bf16.msra.mxu0 %v2311_v44 }
 0x148   :  { %1923 = vmatpush3.bf16.msra.mxu1 %v2322_v48  ;;  %v426_v11 = vcombine.high %v424_v9, %v424_v9  ;;  %v440_v12 = vrot.slane %v424_v9, %v2448_v3  ;;  %v447_v13 = vrot.slane %v425_v10, %v2448_v3  ;;  %v455_v14 = vcombine.high %v433_v0, %v433_v0 }
 0x149   :  { %1750 = vst.sshfl [vmem:[%s3046_s4 + $0x8] sm:$0x1 pattern:$0x73625140] %v425_v10  ;;  %659 = vmatprep.subr.bf16.mxu0 %v2313_v45  ;;  %1924 = vmatprep.subr.bf16.mxu1 %v2153_v41 }
 0x14a   :  { %1751 = vst.sshfl [vmem:[%s3046_s4 + $0x20] sm:$0x1 pattern:$0x73625140] %v424_v9  ;;  %689 = vmatprep.mubr.bf16.mxu0 %v2154_v42  ;;  %v454_v15 = vrot.slane %v426_v11, %v2448_v3  ;;  %v456_v16 = vcombine.high %v440_v12, %v440_v12  ;;  %v457_v17 = vcombine.high %v447_v13, %v447_v13  ;;  %469 = vst [vmem:[%s3046_s4 + $0x10] sm:$0x1] %v455_v14 }
 0x14b   :  { %1752 = vst.sshfl [vmem:[%s3046_s4 + $0x28] sm:$0x1 pattern:$0x73625140] %v426_v11  ;;  %1938 = vmatprep.mubr.msk.bf16.mxu1 %vm2155_vm0, %v2153_v41  ;;  %660 = vmatpush1.bf16.msra.mxu0 %v2318_v46 }
 0x14c   :  { %1925 = vmatpush3.bf16.msra.mxu1 %v2327_v49  ;;  %v458_v18 = vcombine.high %v454_v15, %v454_v15  ;;  %470 = vst [vmem:[%s3046_s4 + $0x18] sm:$0x1] %v457_v17  ;;  %473 = vst [vmem:[%s3046_s4 + $0x30] sm:$0x1] %v456_v16  ;;  %661 = vmatprep.subr.bf16.mxu0 %v2320_v47 }
 0x14d   :  { %1926 = vmatprep.subr.bf16.mxu1 %v2153_v41 }
 0x14e   :  { %474 = vst [vmem:[%s3046_s4 + $0x38] sm:$0x1] %v458_v18 }
 0x14f   :  { %662 = vmatpush1.bf16.msra.mxu0 %v2330_v50 }
 0x150   :  { %1927 = vmatpush3.bf16.msra.mxu1 %v2337_v52  ;;  %663 = vmatprep.subr.bf16.mxu0 %v2332_v51 }
 0x151   :  { %1928 = vmatprep.subr.bf16.mxu1 %v2153_v41 }
 0x153   :  { %664 = vmatpush1.bf16.msra.mxu0 %v2340_v53 }
 0x154   :  { %1929 = vmatpush3.bf16.msra.mxu1 %v2347_v55  ;;  %665 = vmatprep.subr.bf16.mxu0 %v2342_v54 }
 0x155   :  { %1930 = vmatprep.subr.bf16.mxu1 %v2153_v41 }
 0x157   :  { %666 = vmatpush1.bf16.msra.mxu0 %v2350_v56 }
 0x158   :  { %1931 = vmatpush3.bf16.msra.mxu1 %v2357_v58  ;;  %667 = vmatprep.subr.bf16.mxu0 %v2352_v57 }
 0x159   :  { %1932 = vmatprep.subr.bf16.mxu1 %v2153_v41 }
 0x15b   :  { %668 = vmatpush1.bf16.msra.mxu0 %v2360_v59 }
 0x15c   :  { %1933 = vmatpush3.bf16.msra.mxu1 %v2367_v61  ;;  %669 = vmatprep.subr.bf16.mxu0 %v2362_v60 }
 0x15d   :  { %1934 = vmatprep.subr.bf16.mxu1 %v2153_v41 }
 0x15f   :  { %670 = vmatpush1.bf16.msra.mxu0 %v2370_v62 }
 0x160   :  { %1935 = vmatpush3.bf16.msra.mxu1 %v2382_v1  ;;  %671 = vmatprep.subr.bf16.mxu0 %v2372_v63 }
 0x161   :  { %1936 = vmatprep.subr.bf16.mxu1 %v2153_v41 }
 0x163   :  { %672 = vmatpush1.bf16.msra.mxu0 %v2385_v2 }
 0x164   :  { %1937 = vmatpush3.bf16.msra.mxu1 %v2392_v4  ;;  %835 = vmatprep.subr.bf16.mxu0 %v2309_v43 }
 0x165   :  { %1942 = vmatprep.subr.bf16.mxu1 %v2153_v41 }
 0x219   :  { %v513_v21 = vpop.f32.mrb[4].mxu0 }
 0x21a   :  { %v554_v22 = vpop.f32.mrb[4].mxu1  ;;  %v561_v25 = vadd.f32 %v560_v20, %v513_v21  ;;  %v515_v26 = vpop.f32.mrb[5].mxu0 }
 0x21b   :  { %v1920_v28 = vpop.f32.mrb[5].mxu1  ;;  %v517_v29 = vpop.f32.mrb[6].mxu0  ;;  %v572_v35 = vadd.f32 %v571_v34, %v515_v26  ;;  %v579_v40 = vadd.f32 %v2438_v23, %v554_v22 }
 0x21c   :  { %v557_v30 = vpop.f32.mrb[6].mxu1  ;;  %v1755_v31 = vmul.f32 -1.442695, %v561_v25  ;;  %v518_v32 = vpop.f32.mrb[7].mxu0  ;;  %v1761_v29 = vld [vmem:[%s3042_s0 + $0x18] sm:$0xff] }
 0x21d   :  { %v1921_v33 = vpop.f32.mrb[7].mxu1  ;;  %v1756_v36 = vmul.f32 -1.442695, %v572_v35  ;;  %v738_v30 = vunpack.c.l.bf16 %v1761_v29  ;;  %v747_v35 = vrot.slane %v1761_v29, 4 }
 0x21e   :  { %2056 = vpow2.f32 %v1755_v31 }
 0x21f   :  { %2058 = vpow2.f32 %v1756_v36 }
 0x228   :  { %v2057_v37 = vpop.eup %2056 }
 0x229   :  { %v565_v38 = vadd.f32 1.0, %v2057_v37  ;;  %v2059_v39 = vpop.eup %2058 }
 0x22a   :  { %v576_v10 = vadd.f32 1.0, %v2059_v39 }
 0x22b   :  { %2060 = vrcp.f32 %v565_v38 }
 0x235   :  { %v2061_v7 = vpop.eup %2060 }
 0x236   :  { %v580_v8 = vmul.f32 %v2061_v7, %v579_v40  ;;  %v749_v7 = vunpack.c.l.bf16 %v747_v35 }
 0x238   :  { %v582_v9 = vadd.f32 %v581_v6, %v580_v8 }
 0x23a   :  { %2062 = vtanh.f32 %v582_v9 }
 0x23b   :  { %2064 = vrcp.f32 %v576_v10 }
 0x244   :  { %v2063_v0 = vpop.eup %2062 }
 0x245   :  { %v584_v11 = vsub.f32 %v2450_v5, %v2063_v0  ;;  %v2065_v12 = vpop.eup %2064 }
 0x247   :  { %v585_v13 = vmul.f32 %v2065_v12, %v584_v11  ;;  %v2606_v11 = vld [vmem:[%s3042_s0 + $0x20] ss:$12 sps:$4 sm:$0xff]  }
 0x249   :  { %v2528_v14 = vadd.f32 %v2063_v0, %v585_v13 }
 0x24b   :  { %v588_v15 = vcombine.high %v2528_v14, %v2528_v14  ;;  %v595_v16 = vrot.slane %v2528_v14, %v2448_v3  ;;  %v656_v24 = vpack.c.bf16 %v2528_v14, %v2528_v14 }
 0x24d   :  { %v602_v17 = vrot.slane %v588_v15, %v2448_v3  ;;  %v603_v18 = vcombine.high %v595_v16, %v595_v16  ;;  %v611_v19 = vrot.slane %v595_v16, %v2448_v3  ;;  %1757 = vst.sshfl [vmem:[%s3046_s4 + $0x1] sm:$0x1 pattern:$0x73625140] %v595_v16  ;;  %690 = vmatmul.mubr.bf16.vlgmr.msra.gmra.mrb[8].mxu0 %v656_v24  ;;  %v759_v15 = vunpack.c.l.bf16 %v2606_v11 }
 0x24e   :  { %1939 = vmatmul.mubr.bf16.vlgmr.msra.gmra.mrb[8].mxu1 %v656_v24  ;;  %836 = vmatpush1.bf16.msra.mxu0 %v2311_v44 }
 0x24f   :  { %1943 = vmatpush3.bf16.msra.mxu1 %v2322_v48  ;;  %v604_v5 = vcombine.high %v602_v17, %v602_v17  ;;  %v618_v20 = vrot.slane %v602_v17, %v2448_v3  ;;  %v625_v21 = vrot.slane %v603_v18, %v2448_v3  ;;  %v633_v22 = vcombine.high %v611_v19, %v611_v19 }
 0x250   :  { %1758 = vst.sshfl [vmem:[%s3046_s4 + $0x9] sm:$0x1 pattern:$0x73625140] %v603_v18  ;;  %837 = vmatprep.subr.bf16.mxu0 %v2313_v45  ;;  %1944 = vmatprep.subr.bf16.mxu1 %v2153_v41 }
 0x251   :  { %1759 = vst.sshfl [vmem:[%s3046_s4 + $0x21] sm:$0x1 pattern:$0x73625140] %v602_v17  ;;  %867 = vmatprep.mubr.bf16.mxu0 %v2154_v42  ;;  %v632_v25 = vrot.slane %v604_v5, %v2448_v3  ;;  %v634_v26 = vcombine.high %v618_v20, %v618_v20  ;;  %v635_v27 = vcombine.high %v625_v21, %v625_v21  ;;  %647 = vst [vmem:[%s3046_s4 + $0x11] sm:$0x1] %v633_v22 }
 0x252   :  { %1760 = vst.sshfl [vmem:[%s3046_s4 + $0x29] sm:$0x1 pattern:$0x73625140] %v604_v5  ;;  %1958 = vmatprep.mubr.msk.bf16.mxu1 %vm2155_vm0, %v2153_v41  ;;  %838 = vmatpush1.bf16.msra.mxu0 %v2318_v46 }
 0x253   :  { %1945 = vmatpush3.bf16.msra.mxu1 %v2327_v49  ;;  %v636_v28 = vcombine.high %v632_v25, %v632_v25  ;;  %648 = vst [vmem:[%s3046_s4 + $0x19] sm:$0x1] %v635_v27  ;;  %651 = vst [vmem:[%s3046_s4 + $0x31] sm:$0x1] %v634_v26  ;;  %839 = vmatprep.subr.bf16.mxu0 %v2320_v47 }
 0x254   :  { %1946 = vmatprep.subr.bf16.mxu1 %v2153_v41 }
 0x255   :  { %652 = vst [vmem:[%s3046_s4 + $0x39] sm:$0x1] %v636_v28 }
 0x256   :  { %840 = vmatpush1.bf16.msra.mxu0 %v2330_v50 }
 0x257   :  { %1947 = vmatpush3.bf16.msra.mxu1 %v2337_v52  ;;  %841 = vmatprep.subr.bf16.mxu0 %v2332_v51 }
 0x258   :  { %1948 = vmatprep.subr.bf16.mxu1 %v2153_v41 }
 0x25a   :  { %842 = vmatpush1.bf16.msra.mxu0 %v2340_v53 }
 0x25b   :  { %1949 = vmatpush3.bf16.msra.mxu1 %v2347_v55  ;;  %843 = vmatprep.subr.bf16.mxu0 %v2342_v54 }
 0x25c   :  { %1950 = vmatprep.subr.bf16.mxu1 %v2153_v41 }
 0x25e   :  { %844 = vmatpush1.bf16.msra.mxu0 %v2350_v56 }
 0x25f   :  { %1951 = vmatpush3.bf16.msra.mxu1 %v2357_v58  ;;  %845 = vmatprep.subr.bf16.mxu0 %v2352_v57 }
 0x260   :  { %1952 = vmatprep.subr.bf16.mxu1 %v2153_v41 }
 0x262   :  { %846 = vmatpush1.bf16.msra.mxu0 %v2360_v59 }
 0x263   :  { %1953 = vmatpush3.bf16.msra.mxu1 %v2367_v61  ;;  %847 = vmatprep.subr.bf16.mxu0 %v2362_v60 }
 0x264   :  { %1954 = vmatprep.subr.bf16.mxu1 %v2153_v41 }
 0x266   :  { %848 = vmatpush1.bf16.msra.mxu0 %v2370_v62 }
 0x267   :  { %1955 = vmatpush3.bf16.msra.mxu1 %v2382_v1  ;;  %849 = vmatprep.subr.bf16.mxu0 %v2372_v63 }
 0x268   :  { %1956 = vmatprep.subr.bf16.mxu1 %v2153_v41 }
 0x26a   :  { %850 = vmatpush1.bf16.msra.mxu0 %v2385_v2 }
 0x26b   :  { %1957 = vmatpush3.bf16.msra.mxu1 %v2392_v4  ;;  %1013 = vmatprep.subr.bf16.mxu0 %v2309_v43 }
 0x26c   :  { %1962 = vmatprep.subr.bf16.mxu1 %v2153_v41 }
 0x320   :  { %v691_v31 = vpop.f32.mrb[8].mxu0 }
 0x321   :  { %v732_v32 = vpop.f32.mrb[8].mxu1  ;;  %v739_v33 = vadd.f32 %v738_v30, %v691_v31  ;;  %v693_v34 = vpop.f32.mrb[9].mxu0 }
 0x322   :  { %v1940_v36 = vpop.f32.mrb[9].mxu1  ;;  %v695_v37 = vpop.f32.mrb[10].mxu0  ;;  %v750_v8 = vadd.f32 %v749_v7, %v693_v34  ;;  %v757_v13 = vadd.f32 %v2438_v23, %v732_v32 }
 0x323   :  { %v735_v38 = vpop.f32.mrb[10].mxu1  ;;  %v1763_v39 = vmul.f32 -1.442695, %v739_v33  ;;  %v696_v40 = vpop.f32.mrb[11].mxu0 }
 0x324   :  { %v1941_v6 = vpop.f32.mrb[11].mxu1  ;;  %v1764_v9 = vmul.f32 -1.442695, %v750_v8  ;;  %v1769_v38 = vld [vmem:[%s3042_s0 + $0x24] sm:$0xff] }
 0x325   :  { %2066 = vpow2.f32 %v1763_v39  ;;  %v916_v39 = vunpack.c.l.bf16 %v1769_v38 }
 0x326   :  { %2068 = vpow2.f32 %v1764_v9  ;;  %v925_v9 = vrot.slane %v1769_v38, 4 }
 0x32f   :  { %v2067_v10 = vpop.eup %2066 }
 0x330   :  { %v743_v0 = vadd.f32 1.0, %v2067_v10  ;;  %v2069_v12 = vpop.eup %2068 }
 0x331   :  { %v754_v18 = vadd.f32 1.0, %v2069_v12 }
 0x332   :  { %2070 = vrcp.f32 %v743_v0 }
 0x33c   :  { %v2071_v16 = vpop.eup %2070 }
 0x33d   :  { %v758_v24 = vmul.f32 %v2071_v16, %v757_v13 }
 0x33f   :  { %v760_v17 = vadd.f32 %v759_v15, %v758_v24  ;;  %v927_v24 = vunpack.c.l.bf16 %v925_v9 }
 0x341   :  { %2072 = vtanh.f32 %v760_v17 }
 0x342   :  { %2074 = vrcp.f32 %v754_v18 }
 0x34b   :  { %v2073_v19 = vpop.eup %2072 }
 0x34c   :  { %v762_v5 = vsub.f32 %v2528_v14, %v2073_v19  ;;  %v2075_v20 = vpop.eup %2074 }
 0x34e   :  { %v763_v21 = vmul.f32 %v2075_v20, %v762_v5 }
 0x350   :  { %v2611_v22 = vadd.f32 %v2073_v19, %v763_v21 }
 0x352   :  { %v766_v25 = vcombine.high %v2611_v22, %v2611_v22  ;;  %v773_v26 = vrot.slane %v2611_v22, %v2448_v3  ;;  %v834_v27 = vpack.c.bf16 %v2611_v22, %v2611_v22 }
 0x354   :  { %v780_v28 = vrot.slane %v766_v25, %v2448_v3  ;;  %v781_v29 = vcombine.high %v773_v26, %v773_v26  ;;  %v789_v30 = vrot.slane %v773_v26, %v2448_v3  ;;  %1765 = vst.sshfl [vmem:[%s3046_s4 + $0x2] sm:$0x1 pattern:$0x73625140] %v773_v26  ;;  %868 = vmatmul.mubr.bf16.vlgmr.msra.gmra.mrb[12].mxu0 %v834_v27  ;;  %v937_v25 = vunpack.c.h.bf16 %v2606_v11 }
 0x355   :  { %1959 = vmatmul.mubr.bf16.vlgmr.msra.gmra.mrb[12].mxu1 %v834_v27  ;;  %1014 = vmatpush1.bf16.msra.mxu0 %v2311_v44 }
 0x356   :  { %1963 = vmatpush3.bf16.msra.mxu1 %v2322_v48  ;;  %v782_v14 = vcombine.high %v780_v28, %v780_v28  ;;  %v796_v31 = vrot.slane %v780_v28, %v2448_v3  ;;  %v803_v32 = vrot.slane %v781_v29, %v2448_v3  ;;  %v811_v33 = vcombine.high %v789_v30, %v789_v30 }
 0x357   :  { %1766 = vst.sshfl [vmem:[%s3046_s4 + $0xa] sm:$0x1 pattern:$0x73625140] %v781_v29  ;;  %1015 = vmatprep.subr.bf16.mxu0 %v2313_v45  ;;  %1964 = vmatprep.subr.bf16.mxu1 %v2153_v41 }
 0x358   :  { %1767 = vst.sshfl [vmem:[%s3046_s4 + $0x22] sm:$0x1 pattern:$0x73625140] %v780_v28  ;;  %1045 = vmatprep.mubr.bf16.mxu0 %v2154_v42  ;;  %v810_v34 = vrot.slane %v782_v14, %v2448_v3  ;;  %v812_v35 = vcombine.high %v796_v31, %v796_v31  ;;  %v813_v36 = vcombine.high %v803_v32, %v803_v32  ;;  %825 = vst [vmem:[%s3046_s4 + $0x12] sm:$0x1] %v811_v33 }
 0x359   :  { %1768 = vst.sshfl [vmem:[%s3046_s4 + $0x2a] sm:$0x1 pattern:$0x73625140] %v782_v14  ;;  %1978 = vmatprep.mubr.msk.bf16.mxu1 %vm2155_vm0, %v2153_v41  ;;  %1016 = vmatpush1.bf16.msra.mxu0 %v2318_v46 }
 0x35a   :  { %1965 = vmatpush3.bf16.msra.mxu1 %v2327_v49  ;;  %v814_v37 = vcombine.high %v810_v34, %v810_v34  ;;  %826 = vst [vmem:[%s3046_s4 + $0x1a] sm:$0x1] %v813_v36  ;;  %829 = vst [vmem:[%s3046_s4 + $0x32] sm:$0x1] %v812_v35  ;;  %1017 = vmatprep.subr.bf16.mxu0 %v2320_v47 }
 0x35b   :  { %1966 = vmatprep.subr.bf16.mxu1 %v2153_v41 }
 0x35c   :  { %830 = vst [vmem:[%s3046_s4 + $0x3a] sm:$0x1] %v814_v37 }
 0x35d   :  { %1018 = vmatpush1.bf16.msra.mxu0 %v2330_v50 }
 0x35e   :  { %1967 = vmatpush3.bf16.msra.mxu1 %v2337_v52  ;;  %1019 = vmatprep.subr.bf16.mxu0 %v2332_v51 }
 0x35f   :  { %1968 = vmatprep.subr.bf16.mxu1 %v2153_v41 }
 0x361   :  { %1020 = vmatpush1.bf16.msra.mxu0 %v2340_v53 }
 0x362   :  { %1969 = vmatpush3.bf16.msra.mxu1 %v2347_v55  ;;  %1021 = vmatprep.subr.bf16.mxu0 %v2342_v54 }
 0x363   :  { %1970 = vmatprep.subr.bf16.mxu1 %v2153_v41 }
 0x365   :  { %1022 = vmatpush1.bf16.msra.mxu0 %v2350_v56 }
 0x366   :  { %1971 = vmatpush3.bf16.msra.mxu1 %v2357_v58  ;;  %1023 = vmatprep.subr.bf16.mxu0 %v2352_v57 }
 0x367   :  { %1972 = vmatprep.subr.bf16.mxu1 %v2153_v41 }
 0x369   :  { %1024 = vmatpush1.bf16.msra.mxu0 %v2360_v59 }
 0x36a   :  { %1973 = vmatpush3.bf16.msra.mxu1 %v2367_v61  ;;  %1025 = vmatprep.subr.bf16.mxu0 %v2362_v60 }
 0x36b   :  { %1974 = vmatprep.subr.bf16.mxu1 %v2153_v41 }
 0x36d   :  { %1026 = vmatpush1.bf16.msra.mxu0 %v2370_v62 }
 0x36e   :  { %1975 = vmatpush3.bf16.msra.mxu1 %v2382_v1  ;;  %1027 = vmatprep.subr.bf16.mxu0 %v2372_v63 }
 0x36f   :  { %1976 = vmatprep.subr.bf16.mxu1 %v2153_v41 }
 0x371   :  { %1028 = vmatpush1.bf16.msra.mxu0 %v2385_v2 }
 0x372   :  { %1977 = vmatpush3.bf16.msra.mxu1 %v2392_v4  ;;  %1191 = vmatprep.subr.bf16.mxu0 %v2309_v43 }
 0x373   :  { %1982 = vmatprep.subr.bf16.mxu1 %v2153_v41 }
 0x427   :  { %v869_v40 = vpop.f32.mrb[12].mxu0 }
 0x428   :  { %v910_v6 = vpop.f32.mrb[12].mxu1  ;;  %v917_v7 = vadd.f32 %v916_v39, %v869_v40  ;;  %v871_v8 = vpop.f32.mrb[13].mxu0 }
 0x429   :  { %v1960_v10 = vpop.f32.mrb[13].mxu1  ;;  %v873_v0 = vpop.f32.mrb[14].mxu0  ;;  %v928_v17 = vadd.f32 %v927_v24, %v871_v8  ;;  %v935_v21 = vadd.f32 %v2438_v23, %v910_v6 }
 0x42a   :  { %v913_v12 = vpop.f32.mrb[14].mxu1  ;;  %v1771_v13 = vmul.f32 -1.442695, %v917_v7  ;;  %v874_v15 = vpop.f32.mrb[15].mxu0 }
 0x42b   :  { %v1961_v16 = vpop.f32.mrb[15].mxu1  ;;  %v1772_v18 = vmul.f32 -1.442695, %v928_v17 }
 0x42c   :  { %2076 = vpow2.f32 %v1771_v13 }
 0x42d   :  { %2078 = vpow2.f32 %v1772_v18 }
 0x436   :  { %v2077_v19 = vpop.eup %2076 }
 0x437   :  { %v921_v5 = vadd.f32 1.0, %v2077_v19  ;;  %v2079_v20 = vpop.eup %2078 }
 0x438   :  { %v932_v29 = vadd.f32 1.0, %v2079_v20 }
 0x439   :  { %2080 = vrcp.f32 %v921_v5 }
 0x443   :  { %v2081_v26 = vpop.eup %2080 }
 0x444   :  { %v936_v27 = vmul.f32 %v2081_v26, %v935_v21  ;;  %v2785_v26 = vld [vmem:[#allocation3] sm:$0xff] }
 0x446   :  { %v938_v28 = vadd.f32 %v937_v25, %v936_v27  ;;  %v2788_v27 = vld [vmem:[#allocation3 + $0x10] sm:$0xff] }
 0x448   :  { %2082 = vtanh.f32 %v938_v28 }
 0x449   :  { %2084 = vrcp.f32 %v932_v29 }
 0x452   :  { %v2083_v30 = vpop.eup %2082 }
 0x453   :  { %v940_v14 = vsub.f32 %v2611_v22, %v2083_v30  ;;  %v2085_v31 = vpop.eup %2084 }
 0x455   :  { %v941_v32 = vmul.f32 %v2085_v31, %v940_v14  ;;  %v2799_v31 = vld [vmem:[#allocation3 + $0x20] sm:$0xff] }
 0x457   :  { %v2689_v33 = vadd.f32 %v2083_v30, %v941_v32 }
 0x459   :  { %v944_v34 = vcombine.high %v2689_v33, %v2689_v33  ;;  %v951_v35 = vrot.slane %v2689_v33, %v2448_v3  ;;  %v1012_v11 = vpack.c.bf16 %v2689_v33, %v2689_v33 }
 0x45b   :  { %v958_v36 = vrot.slane %v944_v34, %v2448_v3  ;;  %v959_v37 = vcombine.high %v951_v35, %v951_v35  ;;  %v967_v38 = vrot.slane %v951_v35, %v2448_v3  ;;  %1773 = vst.sshfl [vmem:[%s3046_s4 + $0x3] sm:$0x1 pattern:$0x73625140] %v951_v35  ;;  %1046 = vmatmul.mubr.bf16.vlgmr.msra.gmra.mrb[16].mxu0 %v1012_v11  ;;  %v2813_v35 = vld [vmem:[#allocation3 + $0x18] sm:$0xff] }
 0x45c   :  { %1979 = vmatmul.mubr.bf16.vlgmr.msra.gmra.mrb[16].mxu1 %v1012_v11  ;;  %1192 = vmatpush1.bf16.msra.mxu0 %v2311_v44  ;;  %v2816_v11 = vld [vmem:[#allocation3 + $0x28] sm:$0xff] }
 0x45d   :  { %1983 = vmatpush3.bf16.msra.mxu1 %v2322_v48  ;;  %v960_v22 = vcombine.high %v958_v36, %v958_v36  ;;  %v974_v39 = vrot.slane %v958_v36, %v2448_v3  ;;  %v981_v40 = vrot.slane %v959_v37, %v2448_v3  ;;  %v989_v6 = vcombine.high %v967_v38, %v967_v38  ;;  %v2832_v38 = vld [vmem:[#allocation3 + $0x30] sm:$0xff] }
 0x45e   :  { %1774 = vst.sshfl [vmem:[%s3046_s4 + $0xb] sm:$0x1 pattern:$0x73625140] %v959_v37  ;;  %1193 = vmatprep.subr.bf16.mxu0 %v2313_v45  ;;  %1984 = vmatprep.subr.bf16.mxu1 %v2153_v41  ;;  %v2825_v37 = vld [vmem:[#allocation3 + $0x38] sm:$0xff] }
 0x45f   :  { %1775 = vst.sshfl [vmem:[%s3046_s4 + $0x23] sm:$0x1 pattern:$0x73625140] %v958_v36  ;;  %1223 = vmatprep.mubr.bf16.mxu0 %v2154_v42  ;;  %v988_v44 = vrot.slane %v960_v22, %v2448_v3  ;;  %v990_v48 = vcombine.high %v974_v39, %v974_v39  ;;  %v991_v7 = vcombine.high %v981_v40, %v981_v40  ;;  %1003 = vst [vmem:[%s3046_s4 + $0x13] sm:$0x1] %v989_v6 }
 0x460   :  { %1776 = vst.sshfl [vmem:[%s3046_s4 + $0x2b] sm:$0x1 pattern:$0x73625140] %v960_v22  ;;  %1998 = vmatprep.mubr.msk.bf16.mxu1 %vm2155_vm0, %v2153_v41  ;;  %1194 = vmatpush1.bf16.msra.mxu0 %v2318_v46  ;;  %v1777_v46 = vld [vmem:[%s3042_s0 + $0x30] sm:$0xff]  ;;  %v2835_v22 = vld [vmem:[#allocation3 + $0x40] sm:$0xff] }
 0x461   :  { %1985 = vmatpush3.bf16.msra.mxu1 %v2327_v49  ;;  %v992_v45 = vcombine.high %v988_v44, %v988_v44  ;;  %1004 = vst [vmem:[%s3046_s4 + $0x1b] sm:$0x1] %v991_v7  ;;  %1007 = vst [vmem:[%s3046_s4 + $0x33] sm:$0x1] %v990_v48  ;;  %1195 = vmatprep.subr.bf16.mxu0 %v2320_v47  ;;  %v1094_v47 = vunpack.c.l.bf16 %v1777_v46  ;;  %v2838_v39 = vld [vmem:[#allocation3 + $0x50] sm:$0xff]  ;;  %v2842_v40 = vld [vmem:[#allocation3 + $0x48] sm:$0xff] }
 0x462   :  { %1986 = vmatprep.subr.bf16.mxu1 %v2153_v41  ;;  %v2845_v6 = vld [vmem:[#allocation3 + $0x58] sm:$0xff]  ;;  %v2848_v44 = vld [vmem:[#allocation3 + $0x68] sm:$0xff]  ;;  %v2852_v48 = vld [vmem:[#allocation3 + $0x60] sm:$0xff] }
 0x463   :  { %1008 = vst [vmem:[%s3046_s4 + $0x3b] sm:$0x1] %v992_v45  ;;  %v2855_v7 = vld [vmem:[#allocation3 + $0x70] sm:$0xff]  ;;  %v2858_v45 = vld [vmem:[#allocation3 + $0x80] sm:$0xff] }
 0x464   :  { %1196 = vmatpush1.bf16.msra.mxu0 %v2330_v50 }
 0x465   :  { %1987 = vmatpush3.bf16.msra.mxu1 %v2337_v52  ;;  %1197 = vmatprep.subr.bf16.mxu0 %v2332_v51 }
 0x466   :  { %1988 = vmatprep.subr.bf16.mxu1 %v2153_v41 }
 0x468   :  { %1198 = vmatpush1.bf16.msra.mxu0 %v2340_v53  ;;  %v1103_v53 = vrot.slane %v1777_v46, 4  ;;  %v2862_v46 = vld [vmem:[#allocation3 + $0x78] sm:$0xff] }
 0x469   :  { %1989 = vmatpush3.bf16.msra.mxu1 %v2347_v55  ;;  %1199 = vmatprep.subr.bf16.mxu0 %v2342_v54 }
 0x46a   :  { %1990 = vmatprep.subr.bf16.mxu1 %v2153_v41 }
 0x46c   :  { %1200 = vmatpush1.bf16.msra.mxu0 %v2350_v56 }
 0x46d   :  { %1991 = vmatpush3.bf16.msra.mxu1 %v2357_v58  ;;  %1201 = vmatprep.subr.bf16.mxu0 %v2352_v57 }
 0x46e   :  { %1992 = vmatprep.subr.bf16.mxu1 %v2153_v41 }
 0x470   :  { %1202 = vmatpush1.bf16.msra.mxu0 %v2360_v59 }
 0x471   :  { %1993 = vmatpush3.bf16.msra.mxu1 %v2367_v61  ;;  %1203 = vmatprep.subr.bf16.mxu0 %v2362_v60 }
 0x472   :  { %1994 = vmatprep.subr.bf16.mxu1 %v2153_v41 }
 0x474   :  { %1204 = vmatpush1.bf16.msra.mxu0 %v2370_v62 }
 0x475   :  { %1995 = vmatpush3.bf16.msra.mxu1 %v2382_v1  ;;  %1205 = vmatprep.subr.bf16.mxu0 %v2372_v63  ;;  %v2767_v1 = vld [vmem:[%s3042_s0 + $0x38] ss:$12 sps:$4 sm:$0xff]  }
 0x476   :  { %1996 = vmatprep.subr.bf16.mxu1 %v2153_v41  ;;  %v1115_v8 = vunpack.c.l.bf16 %v2767_v1 }
 0x478   :  { %1206 = vmatpush1.bf16.msra.mxu0 %v2385_v2 }
 0x479   :  { %1997 = vmatpush3.bf16.msra.mxu1 %v2392_v4  ;;  %1369 = vmatprep.subr.bf16.mxu0 %v2309_v43  ;;  %v1105_v43 = vunpack.c.l.bf16 %v1103_v53  ;;  %v2882_v53 = vld [vmem:[#allocation3 + $0xa8] sm:$0xff] }
 0x47a   :  { %2002 = vmatprep.subr.bf16.mxu1 %v2153_v41 }
 0x52e   :  { %v1047_v49 = vpop.f32.mrb[16].mxu0 }
 0x52f   :  { %v1088_v50 = vpop.f32.mrb[16].mxu1  ;;  %v1095_v51 = vadd.f32 %v1094_v47, %v1047_v49  ;;  %v1049_v52 = vpop.f32.mrb[17].mxu0  ;;  %v2865_v47 = vld [vmem:[#allocation3 + $0x88] sm:$0xff]  ;;  %v2868_v49 = vld [vmem:[#allocation3 + $0x98] sm:$0xff] }
 0x530   :  { %v1980_v54 = vpop.f32.mrb[17].mxu1  ;;  %v1051_v55 = vpop.f32.mrb[18].mxu0  ;;  %v1106_v60 = vadd.f32 %v1105_v43, %v1049_v52  ;;  %v1113_v4 = vadd.f32 %v2438_v23, %v1088_v50  ;;  %v2872_v50 = vld [vmem:[#allocation3 + $0x90] sm:$0xff] }
 0x531   :  { %v1091_v56 = vpop.f32.mrb[18].mxu1  ;;  %v1779_v57 = vmul.f32 -1.442695, %v1095_v51  ;;  %v1052_v58 = vpop.f32.mrb[19].mxu0  ;;  %v2875_v51 = vld [vmem:[#allocation3 + $0xa0] sm:$0xff]  ;;  %v2878_v52 = vld [vmem:[#allocation3 + $0xb0] sm:$0xff] }
 0x532   :  { %v1981_v59 = vpop.f32.mrb[19].mxu1  ;;  %v1780_v61 = vmul.f32 -1.442695, %v1106_v60  ;;  %v2885_v54 = vld [vmem:[#allocation3 + $0xb8] sm:$0xff]  ;;  %v2149_v55 = vld [vmem:[#allocation3 + $0x8] sm:$0xff] }
 0x533   :  { %2086 = vpow2.f32 %v1779_v57  ;;  %v1785_v56 = vld [vmem:[%s3042_s0 + $0x3c] sm:$0xff] }
 0x534   :  { %2088 = vpow2.f32 %v1780_v61  ;;  %v1272_v57 = vunpack.c.l.bf16 %v1785_v56  ;;  %v1281_v61 = vrot.slane %v1785_v56, 4 }
 0x53d   :  { %v2087_v62 = vpop.eup %2086 }
 0x53e   :  { %v1099_v63 = vadd.f32 1.0, %v2087_v62  ;;  %v2089_v2 = vpop.eup %2088 }
 0x53f   :  { %v1110_v12 = vadd.f32 1.0, %v2089_v2 }
 0x540   :  { %2090 = vrcp.f32 %v1099_v63 }
 0x54a   :  { %v2091_v9 = vpop.eup %2090 }
 0x54b   :  { %v1114_v10 = vmul.f32 %v2091_v9, %v1113_v4 }
 0x54d   :  { %v1116_v0 = vadd.f32 %v1115_v8, %v1114_v10  ;;  %v1283_v10 = vunpack.c.l.bf16 %v1281_v61 }
 0x54f   :  { %2092 = vtanh.f32 %v1116_v0 }
 0x550   :  { %2094 = vrcp.f32 %v1110_v12 }
 0x559   :  { %v2093_v13 = vpop.eup %2092 }
 0x55a   :  { %v1118_v15 = vsub.f32 %v2689_v33, %v2093_v13  ;;  %v2095_v16 = vpop.eup %2094 }
 0x55c   :  { %v1119_v24 = vmul.f32 %v2095_v16, %v1118_v15 }
 0x55e   :  { %v2772_v17 = vadd.f32 %v2093_v13, %v1119_v24 }
 0x560   :  { %v1122_v18 = vcombine.high %v2772_v17, %v2772_v17  ;;  %v1129_v19 = vrot.slane %v2772_v17, %v2448_v3  ;;  %v1190_v5 = vpack.c.bf16 %v2772_v17, %v2772_v17 }
 0x562   :  { %v1136_v20 = vrot.slane %v1122_v18, %v2448_v3  ;;  %v1137_v21 = vcombine.high %v1129_v19, %v1129_v19  ;;  %v1145_v25 = vrot.slane %v1129_v19, %v2448_v3  ;;  %1781 = vst.sshfl [vmem:[%s3046_s4 + $0x4] sm:$0x1 pattern:$0x73625140] %v1129_v19  ;;  %1224 = vmatmul.mubr.bf16.vlgmr.msra.gmra.mrb[20].mxu0 %v1190_v5  ;;  %v1293_v18 = vunpack.c.h.bf16 %v2767_v1 }
 0x563   :  { %1999 = vmatmul.mubr.bf16.vlgmr.msra.gmra.mrb[20].mxu1 %v1190_v5  ;;  %1370 = vmatpush1.bf16.msra.mxu0 %v2785_v26 }
 0x564   :  { %2003 = vmatpush3.bf16.msra.mxu1 %v2788_v27  ;;  %v1138_v28 = vcombine.high %v1136_v20, %v1136_v20  ;;  %v1152_v29 = vrot.slane %v1136_v20, %v2448_v3  ;;  %v1159_v30 = vrot.slane %v1137_v21, %v2448_v3  ;;  %v1167_v14 = vcombine.high %v1145_v25, %v1145_v25 }
 0x565   :  { %1782 = vst.sshfl [vmem:[%s3046_s4 + $0xc] sm:$0x1 pattern:$0x73625140] %v1137_v21  ;;  %1371 = vmatprep.subr.bf16.mxu0 %v2799_v31  ;;  %2004 = vmatprep.subr.bf16.mxu1 %v2153_v41 }
 0x566   :  { %1783 = vst.sshfl [vmem:[%s3046_s4 + $0x24] sm:$0x1 pattern:$0x73625140] %v1136_v20  ;;  %1401 = vmatprep.mubr.bf16.mxu0 %v2154_v42  ;;  %v1166_v32 = vrot.slane %v1138_v28, %v2448_v3  ;;  %v1168_v33 = vcombine.high %v1152_v29, %v1152_v29  ;;  %v1169_v34 = vcombine.high %v1159_v30, %v1159_v30  ;;  %1181 = vst [vmem:[%s3046_s4 + $0x14] sm:$0x1] %v1167_v14 }
 0x567   :  { %1784 = vst.sshfl [vmem:[%s3046_s4 + $0x2c] sm:$0x1 pattern:$0x73625140] %v1138_v28  ;;  %2018 = vmatprep.mubr.msk.bf16.mxu1 %vm2155_vm0, %v2153_v41  ;;  %1372 = vmatpush1.bf16.msra.mxu0 %v2813_v35 }
 0x568   :  { %2005 = vmatpush3.bf16.msra.mxu1 %v2816_v11  ;;  %v1170_v36 = vcombine.high %v1166_v32, %v1166_v32  ;;  %1182 = vst [vmem:[%s3046_s4 + $0x1c] sm:$0x1] %v1169_v34  ;;  %1185 = vst [vmem:[%s3046_s4 + $0x34] sm:$0x1] %v1168_v33  ;;  %1373 = vmatprep.subr.bf16.mxu0 %v2825_v37 }
 0x569   :  { %2006 = vmatprep.subr.bf16.mxu1 %v2153_v41 }
 0x56a   :  { %1186 = vst [vmem:[%s3046_s4 + $0x3c] sm:$0x1] %v1170_v36 }
 0x56b   :  { %1374 = vmatpush1.bf16.msra.mxu0 %v2832_v38 }
 0x56c   :  { %2007 = vmatpush3.bf16.msra.mxu1 %v2835_v22  ;;  %1375 = vmatprep.subr.bf16.mxu0 %v2838_v39 }
 0x56d   :  { %2008 = vmatprep.subr.bf16.mxu1 %v2153_v41 }
 0x56f   :  { %1376 = vmatpush1.bf16.msra.mxu0 %v2842_v40 }
 0x570   :  { %2009 = vmatpush3.bf16.msra.mxu1 %v2845_v6  ;;  %1377 = vmatprep.subr.bf16.mxu0 %v2848_v44 }
 0x571   :  { %2010 = vmatprep.subr.bf16.mxu1 %v2153_v41 }
 0x573   :  { %1378 = vmatpush1.bf16.msra.mxu0 %v2852_v48 }
 0x574   :  { %2011 = vmatpush3.bf16.msra.mxu1 %v2855_v7  ;;  %1379 = vmatprep.subr.bf16.mxu0 %v2858_v45 }
 0x575   :  { %2012 = vmatprep.subr.bf16.mxu1 %v2153_v41 }
 0x577   :  { %1380 = vmatpush1.bf16.msra.mxu0 %v2862_v46 }
 0x578   :  { %2013 = vmatpush3.bf16.msra.mxu1 %v2865_v47  ;;  %1381 = vmatprep.subr.bf16.mxu0 %v2868_v49 }
 0x579   :  { %2014 = vmatprep.subr.bf16.mxu1 %v2153_v41 }
 0x57b   :  { %1382 = vmatpush1.bf16.msra.mxu0 %v2872_v50 }
 0x57c   :  { %2015 = vmatpush3.bf16.msra.mxu1 %v2875_v51  ;;  %1383 = vmatprep.subr.bf16.mxu0 %v2878_v52 }
 0x57d   :  { %2016 = vmatprep.subr.bf16.mxu1 %v2153_v41 }
 0x57f   :  { %1384 = vmatpush1.bf16.msra.mxu0 %v2882_v53 }
 0x580   :  { %2017 = vmatpush3.bf16.msra.mxu1 %v2885_v54  ;;  %1547 = vmatprep.subr.bf16.mxu0 %v2149_v55 }
 0x581   :  { %2022 = vmatprep.subr.bf16.mxu1 %v2153_v41 }
 0x635   :  { %v1225_v58 = vpop.f32.mrb[20].mxu0 }
 0x636   :  { %v1266_v59 = vpop.f32.mrb[20].mxu1  ;;  %v1273_v43 = vadd.f32 %v1272_v57, %v1225_v58  ;;  %v1227_v60 = vpop.f32.mrb[21].mxu0 }
 0x637   :  { %v2000_v62 = vpop.f32.mrb[21].mxu1  ;;  %v1229_v63 = vpop.f32.mrb[22].mxu0  ;;  %v1284_v0 = vadd.f32 %v1283_v10, %v1227_v60  ;;  %v1291_v24 = vadd.f32 %v2438_v23, %v1266_v59 }
 0x638   :  { %v1269_v2 = vpop.f32.mrb[22].mxu1  ;;  %v1787_v4 = vmul.f32 -1.442695, %v1273_v43  ;;  %v1230_v8 = vpop.f32.mrb[23].mxu0 }
 0x639   :  { %v2001_v9 = vpop.f32.mrb[23].mxu1  ;;  %v1788_v12 = vmul.f32 -1.442695, %v1284_v0 }
 0x63a   :  { %2096 = vpow2.f32 %v1787_v4 }
 0x63b   :  { %2098 = vpow2.f32 %v1788_v12 }
 0x644   :  { %v2097_v13 = vpop.eup %2096 }
 0x645   :  { %v1277_v15 = vadd.f32 1.0, %v2097_v13  ;;  %v2099_v16 = vpop.eup %2098 }
 0x646   :  { %v1288_v21 = vadd.f32 1.0, %v2099_v16 }
 0x647   :  { %2100 = vrcp.f32 %v1277_v15 }
 0x651   :  { %v2101_v19 = vpop.eup %2100 }
 0x652   :  { %v1292_v5 = vmul.f32 %v2101_v19, %v1291_v24 }
 0x654   :  { %v1294_v20 = vadd.f32 %v1293_v18, %v1292_v5 }
 0x656   :  { %2102 = vtanh.f32 %v1294_v20 }
 0x657   :  { %2104 = vrcp.f32 %v1288_v21 }
 0x660   :  { %v2103_v25 = vpop.eup %2102 }
 0x661   :  { %v1296_v28 = vsub.f32 %v2772_v17, %v2103_v25  ;;  %v2105_v29 = vpop.eup %2104 }
 0x663   :  { %v1297_v30 = vmul.f32 %v2105_v29, %v1296_v28  ;;  %v1801_v29 = vld [vmem:[%s3042_s0 + $0x54] sm:$0xff] }
 0x665   :  { %v2895_v14 = vadd.f32 %v2103_v25, %v1297_v30  ;;  %v1628_v30 = vunpack.c.l.bf16 %v1801_v29 }
 0x667   :  { %v1300_v32 = vcombine.high %v2895_v14, %v2895_v14  ;;  %v1307_v23 = vrot.slane %v2895_v14, %v2448_v3  ;;  %v1368_v1 = vpack.c.bf16 %v2895_v14, %v2895_v14 }
 0x669   :  { %v1314_v33 = vrot.slane %v1300_v32, %v2448_v3  ;;  %v1315_v34 = vcombine.high %v1307_v23, %v1307_v23  ;;  %v1323_v36 = vrot.slane %v1307_v23, %v2448_v3  ;;  %1789 = vst.sshfl [vmem:[%s3046_s4 + $0x5] sm:$0x1 pattern:$0x73625140] %v1307_v23  ;;  %1402 = vmatmul.mubr.bf16.vlgmr.msra.gmra.mrb[24].mxu0 %v1368_v1 }
 0x66a   :  { %2019 = vmatmul.mubr.bf16.vlgmr.msra.gmra.mrb[24].mxu1 %v1368_v1  ;;  %1548 = vmatpush1.bf16.msra.mxu0 %v2785_v26 }
 0x66b   :  { %2023 = vmatpush3.bf16.msra.mxu1 %v2788_v27  ;;  %v1316_v17 = vcombine.high %v1314_v33, %v1314_v33  ;;  %v1330_v55 = vrot.slane %v1314_v33, %v2448_v3  ;;  %v1337_v56 = vrot.slane %v1315_v34, %v2448_v3  ;;  %v1345_v57 = vcombine.high %v1323_v36, %v1323_v36 }
 0x66c   :  { %1790 = vst.sshfl [vmem:[%s3046_s4 + $0xd] sm:$0x1 pattern:$0x73625140] %v1315_v34  ;;  %1549 = vmatprep.subr.bf16.mxu0 %v2799_v31  ;;  %2024 = vmatprep.subr.bf16.mxu1 %v2153_v41  ;;  %v1793_v31 = vld [vmem:[%s3042_s0 + $0x48] sm:$0xff] }
 0x66d   :  { %1791 = vst.sshfl [vmem:[%s3046_s4 + $0x25] sm:$0x1 pattern:$0x73625140] %v1314_v33  ;;  %1579 = vmatprep.mubr.bf16.mxu0 %v2154_v42  ;;  %v1344_v26 = vrot.slane %v1316_v17, %v2448_v3  ;;  %v1346_v27 = vcombine.high %v1330_v55, %v1330_v55  ;;  %v1347_v58 = vcombine.high %v1337_v56, %v1337_v56  ;;  %1359 = vst [vmem:[%s3046_s4 + $0x15] sm:$0x1] %v1345_v57 }
 0x66e   :  { %1792 = vst.sshfl [vmem:[%s3046_s4 + $0x2d] sm:$0x1 pattern:$0x73625140] %v1316_v17  ;;  %2038 = vmatprep.mubr.msk.bf16.mxu1 %vm2155_vm0, %v2153_v41  ;;  %1550 = vmatpush1.bf16.msra.mxu0 %v2813_v35  ;;  %v1450_v35 = vunpack.c.l.bf16 %v1793_v31  ;;  %v1637_v33 = vrot.slane %v1801_v29, 4 }
 0x66f   :  { %2025 = vmatpush3.bf16.msra.mxu1 %v2816_v11  ;;  %v1348_v42 = vcombine.high %v1344_v26, %v1344_v26  ;;  %1360 = vst [vmem:[%s3046_s4 + $0x1d] sm:$0x1] %v1347_v58  ;;  %1363 = vst [vmem:[%s3046_s4 + $0x35] sm:$0x1] %v1346_v27  ;;  %1551 = vmatprep.subr.bf16.mxu0 %v2825_v37 }
 0x670   :  { %2026 = vmatprep.subr.bf16.mxu1 %v2153_v41  ;;  %v1639_v26 = vunpack.c.l.bf16 %v1637_v33 }
 0x671   :  { %1364 = vst [vmem:[%s3046_s4 + $0x3d] sm:$0x1] %v1348_v42 }
 0x672   :  { %1552 = vmatpush1.bf16.msra.mxu0 %v2832_v38 }
 0x673   :  { %2027 = vmatpush3.bf16.msra.mxu1 %v2835_v22  ;;  %1553 = vmatprep.subr.bf16.mxu0 %v2838_v39  ;;  %v1459_v39 = vrot.slane %v1793_v31, 4 }
 0x674   :  { %2028 = vmatprep.subr.bf16.mxu1 %v2153_v41 }
 0x676   :  { %1554 = vmatpush1.bf16.msra.mxu0 %v2842_v40 }
 0x677   :  { %2029 = vmatpush3.bf16.msra.mxu1 %v2845_v6  ;;  %1555 = vmatprep.subr.bf16.mxu0 %v2848_v44 }
 0x678   :  { %2030 = vmatprep.subr.bf16.mxu1 %v2153_v41 }
 0x67a   :  { %1556 = vmatpush1.bf16.msra.mxu0 %v2852_v48 }
 0x67b   :  { %2031 = vmatpush3.bf16.msra.mxu1 %v2855_v7  ;;  %1557 = vmatprep.subr.bf16.mxu0 %v2858_v45  ;;  %v1461_v45 = vunpack.c.l.bf16 %v1459_v39 }
 0x67c   :  { %2032 = vmatprep.subr.bf16.mxu1 %v2153_v41 }
 0x67e   :  { %1558 = vmatpush1.bf16.msra.mxu0 %v2862_v46 }
 0x67f   :  { %2033 = vmatpush3.bf16.msra.mxu1 %v2865_v47  ;;  %1559 = vmatprep.subr.bf16.mxu0 %v2868_v49 }
 0x680   :  { %2034 = vmatprep.subr.bf16.mxu1 %v2153_v41 }
 0x682   :  { %1560 = vmatpush1.bf16.msra.mxu0 %v2872_v50 }
 0x683   :  { %2035 = vmatpush3.bf16.msra.mxu1 %v2875_v51  ;;  %1561 = vmatprep.subr.bf16.mxu0 %v2878_v52  ;;  %v2971_v51 = vld [vmem:[%s3042_s0 + $0x50] ss:$12 sps:$4 sm:$0xff]  }
 0x684   :  { %2036 = vmatprep.subr.bf16.mxu1 %v2153_v41  ;;  %v1471_v59 = vunpack.c.l.bf16 %v2971_v51 }
 0x686   :  { %1562 = vmatpush1.bf16.msra.mxu0 %v2882_v53  ;;  %v2150_v53 = vld [vmem:[%s3045_s3] ss:$0 sm:$0xff] }
 0x687   :  { %2037 = vmatpush3.bf16.msra.mxu1 %v2885_v54 }
 0x73c   :  { %v1403_v11 = vpop.f32.mrb[24].mxu0 }
 0x73d   :  { %v1444_v37 = vpop.f32.mrb[24].mxu1  ;;  %v1451_v38 = vadd.f32 %v1450_v35, %v1403_v11  ;;  %v1405_v22 = vpop.f32.mrb[25].mxu0 }
 0x73e   :  { %v2020_v40 = vpop.f32.mrb[25].mxu1  ;;  %v1407_v6 = vpop.f32.mrb[26].mxu0  ;;  %v1462_v46 = vadd.f32 %v1461_v45, %v1405_v22  ;;  %v1469_v54 = vadd.f32 %v2150_v53, %v1444_v37  ;;  %v1649_v37 = vunpack.c.h.bf16 %v2971_v51 }
 0x73f   :  { %v1447_v44 = vpop.f32.mrb[26].mxu1  ;;  %v1795_v48 = vmul.f32 -1.442695, %v1451_v38  ;;  %v1408_v7 = vpop.f32.mrb[27].mxu0 }
 0x740   :  { %v2021_v41 = vpop.f32.mrb[27].mxu1  ;;  %v1796_v47 = vmul.f32 -1.442695, %v1462_v46 }
 0x741   :  { %2106 = vpow2.f32 %v1795_v48 }
 0x742   :  { %2108 = vpow2.f32 %v1796_v47 }
 0x74b   :  { %v2107_v49 = vpop.eup %2106 }
 0x74c   :  { %v1455_v50 = vadd.f32 1.0, %v2107_v49  ;;  %v2109_v52 = vpop.eup %2108 }
 0x74d   :  { %v1466_v62 = vadd.f32 1.0, %v2109_v52 }
 0x74e   :  { %2110 = vrcp.f32 %v1455_v50 }
 0x758   :  { %v2111_v43 = vpop.eup %2110 }
 0x759   :  { %v1470_v60 = vmul.f32 %v2111_v43, %v1469_v54 }
 0x75b   :  { %v1472_v61 = vadd.f32 %v1471_v59, %v1470_v60 }
 0x75d   :  { %2112 = vtanh.f32 %v1472_v61 }
 0x75e   :  { %2114 = vrcp.f32 %v1466_v62 }
 0x767   :  { %v2113_v63 = vpop.eup %2112 }
 0x768   :  { %v1474_v2 = vsub.f32 %v2895_v14, %v2113_v63  ;;  %v2115_v4 = vpop.eup %2114 }
 0x76a   :  { %v1475_v8 = vmul.f32 %v2115_v4, %v1474_v2 }
 0x76c   :  { %v1476_v9 = vadd.f32 %v2113_v63, %v1475_v8 }
 0x76e   :  { %v1478_v10 = vcombine.high %v1476_v9, %v1476_v9  ;;  %v1485_v0 = vrot.slane %v1476_v9, %v2448_v3  ;;  %v1546_v12 = vpack.c.bf16 %v1476_v9, %v1476_v9 }
 0x770   :  { %v1492_v13 = vrot.slane %v1478_v10, %v2448_v3  ;;  %v1493_v15 = vcombine.high %v1485_v0, %v1485_v0  ;;  %v1501_v16 = vrot.slane %v1485_v0, %v2448_v3  ;;  %1797 = vst.sshfl [vmem:[%s3046_s4 + $0x6] sm:$0x1 pattern:$0x73625140] %v1485_v0  ;;  %1580 = vmatmul.mubr.bf16.vlgmr.msra.gmra.mrb[28].mxu0 %v1546_v12 }
 0x771   :  { %2039 = vmatmul.mubr.bf16.vlgmr.msra.gmra.mrb[28].mxu1 %v1546_v12 }
 0x772   :  { %v1494_v24 = vcombine.high %v1492_v13, %v1492_v13  ;;  %v1508_v18 = vrot.slane %v1492_v13, %v2448_v3  ;;  %v1515_v19 = vrot.slane %v1493_v15, %v2448_v3  ;;  %v1523_v5 = vcombine.high %v1501_v16, %v1501_v16  ;;  %1798 = vst.sshfl [vmem:[%s3046_s4 + $0xe] sm:$0x1 pattern:$0x73625140] %v1493_v15 }
 0x773   :  { %1799 = vst.sshfl [vmem:[%s3046_s4 + $0x26] sm:$0x1 pattern:$0x73625140] %v1492_v13 }
 0x774   :  { %v1522_v20 = vrot.slane %v1494_v24, %v2448_v3  ;;  %v1524_v21 = vcombine.high %v1508_v18, %v1508_v18  ;;  %v1525_v25 = vcombine.high %v1515_v19, %v1515_v19  ;;  %1537 = vst [vmem:[%s3046_s4 + $0x16] sm:$0x1] %v1523_v5  ;;  %1800 = vst.sshfl [vmem:[%s3046_s4 + $0x2e] sm:$0x1 pattern:$0x73625140] %v1494_v24 }
 0x776   :  { %v1526_v28 = vcombine.high %v1522_v20, %v1522_v20  ;;  %1538 = vst [vmem:[%s3046_s4 + $0x1e] sm:$0x1] %v1525_v25  ;;  %1541 = vst [vmem:[%s3046_s4 + $0x36] sm:$0x1] %v1524_v21 }
 0x778   :  { %1542 = vst [vmem:[%s3046_s4 + $0x3e] sm:$0x1] %v1526_v28 }
 0x843   :  { %v1581_v14 = vpop.f32.mrb[28].mxu0 }
 0x844   :  { %v1622_v32 = vpop.f32.mrb[28].mxu1  ;;  %v1629_v23 = vadd.f32 %v1628_v30, %v1581_v14  ;;  %v1583_v1 = vpop.f32.mrb[29].mxu0 }
 0x845   :  { %v2040_v34 = vpop.f32.mrb[29].mxu1  ;;  %v1585_v36 = vpop.f32.mrb[30].mxu0  ;;  %v1640_v27 = vadd.f32 %v1639_v26, %v1583_v1  ;;  %v1647_v11 = vadd.f32 %v2150_v53, %v1622_v32 }
 0x846   :  { %v1625_v17 = vpop.f32.mrb[30].mxu1  ;;  %v1803_v55 = vmul.f32 -1.442695, %v1629_v23  ;;  %v1586_v56 = vpop.f32.mrb[31].mxu0 }
 0x847   :  { %v2041_v57 = vpop.f32.mrb[31].mxu1  ;;  %v1804_v58 = vmul.f32 -1.442695, %v1640_v27 }
 0x848   :  { %2116 = vpow2.f32 %v1803_v55 }
 0x849   :  { %2118 = vpow2.f32 %v1804_v58 }
 0x852   :  { %v2117_v42 = vpop.eup %2116 }
 0x853   :  { %v1633_v31 = vadd.f32 1.0, %v2117_v42  ;;  %v2119_v35 = vpop.eup %2118 }
 0x854   :  { %v1644_v40 = vadd.f32 1.0, %v2119_v35 }
 0x855   :  { %2120 = vrcp.f32 %v1633_v31 }
 0x85f   :  { %v2121_v38 = vpop.eup %2120 }
 0x860   :  { %v1648_v22 = vmul.f32 %v2121_v38, %v1647_v11 }
 0x862   :  { %v1650_v39 = vadd.f32 %v1649_v37, %v1648_v22 }
 0x864   :  { %2122 = vtanh.f32 %v1650_v39 }
 0x865   :  { %2124 = vrcp.f32 %v1644_v40 }
 0x86e   :  { %v2123_v6 = vpop.eup %2122 }
 0x86f   :  { %v1652_v44 = vsub.f32 %v1476_v9, %v2123_v6  ;;  %v2125_v48 = vpop.eup %2124 }
 0x871   :  { %v1653_v7 = vmul.f32 %v2125_v48, %v1652_v44 }
 0x873   :  { %v1654_v41 = vadd.f32 %v2123_v6, %v1653_v7 }
 0x875   :  { %v1656_v45 = vcombine.high %v1654_v41, %v1654_v41  ;;  %v1663_v46 = vrot.slane %v1654_v41, %v2448_v3 }
 0x877   :  { %v1670_v47 = vrot.slane %v1656_v45, %v2448_v3  ;;  %v1671_v49 = vcombine.high %v1663_v46, %v1663_v46  ;;  %v1679_v50 = vrot.slane %v1663_v46, %v2448_v3  ;;  %1805 = vst.sshfl [vmem:[%s3046_s4 + $0x7] sm:$0x1 pattern:$0x73625140] %v1663_v46 }
 0x879   :  { %v1672_v51 = vcombine.high %v1670_v47, %v1670_v47  ;;  %v1686_v52 = vrot.slane %v1670_v47, %v2448_v3  ;;  %v1693_v53 = vrot.slane %v1671_v49, %v2448_v3  ;;  %v1701_v54 = vcombine.high %v1679_v50, %v1679_v50  ;;  %1806 = vst.sshfl [vmem:[%s3046_s4 + $0xf] sm:$0x1 pattern:$0x73625140] %v1671_v49 }
 0x87a   :  { %1807 = vst.sshfl [vmem:[%s3046_s4 + $0x27] sm:$0x1 pattern:$0x73625140] %v1670_v47 }
 0x87b   :  { %v1700_v59 = vrot.slane %v1672_v51, %v2448_v3  ;;  %v1702_v43 = vcombine.high %v1686_v52, %v1686_v52  ;;  %v1703_v60 = vcombine.high %v1693_v53, %v1693_v53  ;;  %1715 = vst [vmem:[%s3046_s4 + $0x17] sm:$0x1] %v1701_v54  ;;  %1808 = vst.sshfl [vmem:[%s3046_s4 + $0x2f] sm:$0x1 pattern:$0x73625140] %v1672_v51 }
 0x87d   :  { %v1704_v61 = vcombine.high %v1700_v59, %v1700_v59  ;;  %1716 = vst [vmem:[%s3046_s4 + $0x1f] sm:$0x1] %v1703_v60  ;;  %1719 = vst [vmem:[%s3046_s4 + $0x37] sm:$0x1] %v1702_v43 }
 0x87f   :  { %1720 = vst [vmem:[%s3046_s4 + $0x3f] sm:$0x1] %v1704_v61 }
 0x880   :  { %1726 = vsyncmov [#allocation4] }
 0x883   :  { %s1727_s6 = vpop.sfrf %1726 }
 0x884   :  { %p1809_p0 = scmp.ne.s32.totalorder %s1727_s6, 0 }
 0x886   :  { %1731 = shalt.err (%p1809_p0)  }

</bundles_post_ra>
